<compile_context>
chip_gen: v6e
topology: v6e:2x2x1
jax: 0.10.0
libtpu: 0.0.40
codegen_flags: <defaults>
</compile_context>

<pallas_src>
import jax
import jax.numpy as jnp
from jax.experimental import pallas as pl
from jax.experimental.pallas import tpu as pltpu


# ----------------------------------------------------------------------------
# Pallas kernel: full Block forward for B_TILE images per grid step.
# ----------------------------------------------------------------------------
def _block_kernel(x_ref,        # (B_TILE, H, WC)  f32 activations, WC = W*C
                  mdw1_ref,     # (7*WC, WC)       bf16 dwconv1(+BN) stacked band matrices
                  wf12_ref,     # (WC, 2*WC3)      bf16 fused f1|f2 block-diag 1x1
                  bf12_ref,     # (1, 2*WC3)       f32  bias (dwconv1 bias folded in)
                  wg_ref,       # (WC3, WC)        bf16 g(+BN) block-diag 1x1
                  bg_ref,       # (1, WC)          f32
                  mdw2_ref,     # (7*WC, WC)       bf16 dwconv2 stacked band matrices
                  bdw2_ref,     # (1, WC)          f32
                  out_ref):     # (B_TILE, H, WC)  f32
    B, H, WC = x_ref.shape
    K = mdw1_ref.shape[0] // WC              # 7
    P = (K - 1) // 2                         # 3
    WC3 = wg_ref.shape[0]                    # W * mlp_ratio * C
    M = B * H                                # matmul M dimension (rows per step)
    cdt = mdw1_ref.dtype                     # bf16 MXU-operand dtype

    # Flatten the batch tile into one (M, WC) matrix (leading-dim merge; H is a
    # multiple of 8 so sublane tiling is unchanged -> no data movement).
    x = x_ref[...].reshape(M, WC)

    # Per-row index within its own image (images are stacked along sublanes).
    row_in_img = jax.lax.broadcasted_iota(jnp.int32, (M, 1), 0) % H

    def depthwise(inp, m_ref):
        # 7x7 depthwise conv as ONE (M, 7*WC) x (7*WC, WC) MXU matmul.
        # The 7 W-direction taps + W zero padding live in the banded matrices
        # (built once in the wrapper); the 7 H-direction taps are static sublane
        # rotations (XLU slot) of the aligned input, zeroed at per-image H
        # boundaries.  No concatenated zero rows, no unaligned sublane slices.
        pieces = []
        for kh in range(K):
            s = P - kh                                        # static row shift
            tap = inp if s == 0 else pltpu.roll(inp, s % M, axis=0)
            if s > 0:      # first s rows of each image would read before row 0
                tap = jnp.where(row_in_img >= s, tap, 0.0)
            elif s < 0:    # last |s| rows of each image would read past row H-1
                tap = jnp.where(row_in_img < H + s, tap, 0.0)
            pieces.append(tap.astype(cdt))
        op = jnp.concatenate(pieces, axis=1)                  # (M, 7*WC), lane-aligned
        return jnp.dot(op, m_ref[...], preferred_element_type=jnp.float32)

    # dwconv (7x7 depthwise; BN + bias folded downstream into bf12)
    h = depthwise(x, mdw1_ref)

    # fused f1|f2 1x1 convs: one (M, WC) x (WC, 2*WC3) matmul, aligned lane slices
    y = jnp.dot(h.astype(cdt), wf12_ref[...],
                preferred_element_type=jnp.float32) + bf12_ref[...]
    t = jnp.maximum(y[:, :WC3], 0.0) * y[:, WC3:]             # ReLU(f1) * f2

    # g 1x1 conv (+BN folded)
    g = jnp.dot(t.astype(cdt), wg_ref[...],
                preferred_element_type=jnp.float32) + bg_ref[...]

    # dwconv2 (7x7 depthwise, bias, no BN) + residual (drop_path = Identity)
    out = x + depthwise(g, mdw2_ref) + bdw2_ref[...]
    out_ref[...] = out.reshape(B, H, WC)


# ----------------------------------------------------------------------------
# Wrapper-side weight re-expression (plain JAX, run ONCE outside the forward).
# ----------------------------------------------------------------------------
def _block_diag(w, W):
    """(Cin, Cout) 1x1-conv weight -> (W*Cin, W*Cout) block-diagonal matmul."""
    eye = jnp.eye(W, dtype=w.dtype)
    cin, cout = w.shape
    return jnp.einsum("pq,io->piqo", eye, w).reshape(W * cin, W * cout)


def _depthwise_band_matrices(w_dw, W):
    """(K, K, C) depthwise weights -> (K*W*C, W*C) row-stacked banded matrices.

    Block kh has M[wi*C+ci, wo*C+co] = w_dw[kh, wi-wo+P, co] if ci == co and
    |wi - wo| <= P, else 0.  The zero band at the W edges reproduces the conv's
    zero padding along W.
    """
    K, _, C = w_dw.shape
    P = (K - 1) // 2
    w_idx = jnp.arange(W)
    kw = w_idx[:, None] - w_idx[None, :] + P                   # (W_in, W_out)
    valid = ((kw >= 0) & (kw < K)).astype(w_dw.dtype)
    tap = w_dw[:, jnp.clip(kw, 0, K - 1), :] * valid[None, :, :, None]   # (K,Wi,Wo,C)
    eye_c = jnp.eye(C, dtype=w_dw.dtype)
    m = jnp.einsum("kpqc,dc->kpdqc", tap, eye_c)               # (K, Wi, Ci, Wo, Co)
    return m.reshape(K * W * C, W * C)


def prepare_lane_dense_params(p, W, compute_dtype=jnp.bfloat16):
    """One-time re-expression of Block params for the lane-dense kernel.

    Call once and reuse: re-running this per forward call would add several
    extra XLA ops + HBM writes around an otherwise overhead-bound kernel.
    """
    w_f12 = jnp.concatenate([_block_diag(p["w_f1"], W),
                             _block_diag(p["w_f2"], W)], axis=1)      # (WC, 2*WC3)
    b_f12 = jnp.concatenate([jnp.tile(p["b_f1"], (1, W)),
                             jnp.tile(p["b_f2"], (1, W))], axis=1)    # (1, 2*WC3)
    # dwconv1(+BN) bias only feeds the linear f1/f2 -> fold it in exactly (f32).
    b_dw1 = jnp.tile(p["b_dw1"], (1, W))                              # (1, WC)
    b_f12 = b_f12 + b_dw1 @ w_f12
    return dict(
        m_dw1=_depthwise_band_matrices(p["w_dw1"], W).astype(compute_dtype),
        w_f12=w_f12.astype(compute_dtype),
        b_f12=b_f12.astype(jnp.float32),
        w_g=_block_diag(p["w_g"], W).astype(compute_dtype),
        b_g=jnp.tile(p["b_g"], (1, W)).astype(jnp.float32),
        m_dw2=_depthwise_band_matrices(p["w_dw2"], W).astype(compute_dtype),
        b_dw2=jnp.tile(p["b_dw2"], (1, W)).astype(jnp.float32),
    )


def _pick_batch_tile(N, H, target_rows=128):
    """Grow matmul M towards ~128 rows, keeping >=2 grid steps when N allows."""
    bt = max(1, min(N, target_rows // H))
    while bt > 1 and (N % bt != 0 or N // bt < 2):
        bt -= 1
    return bt


@jax.jit
def block_forward_lane_dense(x_ld, ldp):
    """Block forward on (N, H, W*C) lane-dense activations (f32 in / f32 out)."""
    N, H, WC = x_ld.shape
    B_TILE = _pick_batch_tile(N, H)
    KWC = ldp["m_dw1"].shape[0]
    WC3x2 = ldp["w_f12"].shape[1]
    WC3 = WC3x2 // 2

    const = lambda shape: pl.BlockSpec(shape, lambda n: (0,) * len(shape))

    grid_spec = pltpu.PrefetchScalarGridSpec(
        num_scalar_prefetch=0,
        grid=(N // B_TILE,),
        in_specs=[
            pl.BlockSpec((B_TILE, H, WC), lambda n: (n, 0, 0)),    # x (lane-dense)
            const((KWC, WC)),                                      # dwconv1 bands
            const((WC, WC3x2)), const((1, WC3x2)),                 # fused f1|f2
            const((WC3, WC)), const((1, WC)),                      # g (+BN)
            const((KWC, WC)), const((1, WC)),                      # dwconv2 bands
        ],
        out_specs=pl.BlockSpec((B_TILE, H, WC), lambda n: (n, 0, 0)),
    )

    return pl.pallas_call(
        _block_kernel,
        out_shape=jax.ShapeDtypeStruct((N, H, WC), jnp.float32),
        grid_spec=grid_spec,
        input_output_aliases={0: 0},     # residual output reuses x's HBM buffer
        compiler_params=pltpu.CompilerParams(
            dimension_semantics=("parallel",)),
    )(x_ld, ldp["m_dw1"], ldp["w_f12"], ldp["b_f12"],
      ldp["w_g"], ldp["b_g"], ldp["m_dw2"], ldp["b_dw2"])


@jax.jit
def block_forward_nchw(x_nchw, ldp):
    """NCHW convenience wrapper (matches PyTorch Block.forward I/O layout).

    In a full StarNet, keep activations in (N, H, W*C) across Blocks and call
    block_forward_lane_dense directly: each NCHW<->lane-dense transpose is a
    full HBM read+write pass in a separate XLA op.
    """
    N, C, H, W = x_nchw.shape
    x_ld = jnp.transpose(x_nchw, (0, 2, 3, 1)).reshape(N, H, W * C)
    y_ld = block_forward_lane_dense(x_ld, ldp)
    return jnp.transpose(y_ld.reshape(N, H, W, C), (0, 3, 1, 2))


# ----------------------------------------------------------------------------
# Deterministic parameter construction (BN folded, eval-mode semantics).
# ----------------------------------------------------------------------------
def make_params(dim, mlp_ratio=3, seed=0):
    C, C3 = dim, mlp_ratio * dim
    keys = jax.random.split(jax.random.PRNGKey(seed), 10)
    eps = 1e-5
    # BN init from the module: gamma=1, beta=0, running_mean=0, running_var=1.
    bn_scale = jnp.float32(1.0 / jnp.sqrt(1.0 + eps))
    bn_shift = jnp.float32(0.0)

    def rnd(k, shape, s=0.1):
        return jax.random.normal(k, shape, jnp.float32) * s

    # dwconv: Conv2d(dim, dim, 7, groups=dim) -> weights stored as (7, 7, C)
    w_dw1 = rnd(keys[0], (7, 7, C)) * bn_scale                 # BN folded
    b_dw1 = rnd(keys[1], (1, C)) * bn_scale + bn_shift

    # f1 / f2: 1x1 convs dim -> 3*dim, stored as (in, out) matmul weights
    w_f1 = rnd(keys[2], (C, C3)); b_f1 = rnd(keys[3], (1, C3))
    w_f2 = rnd(keys[4], (C, C3)); b_f2 = rnd(keys[5], (1, C3))

    # g: 1x1 conv 3*dim -> dim, with BN (folded)
    w_g = rnd(keys[6], (C3, C)) * bn_scale
    b_g = rnd(keys[7], (1, C)) * bn_scale + bn_shift

    # dwconv2: depthwise 7x7, no BN
    w_dw2 = rnd(keys[8], (7, 7, C))
    b_dw2 = rnd(keys[9], (1, C))

    return dict(w_dw1=w_dw1, b_dw1=b_dw1, w_f1=w_f1, b_f1=b_f1,
                w_f2=w_f2, b_f2=b_f2, w_g=w_g, b_g=b_g,
                w_dw2=w_dw2, b_dw2=b_dw2)


# ----------------------------------------------------------------------------
# Pure-JAX f32 reference (mirrors the PyTorch module in eval mode).
# ----------------------------------------------------------------------------
def ref_block_nhwc(x, p):
    N, H, W, C = x.shape

    def dwconv(inp, w, b):
        return jax.lax.conv_general_dilated(
            inp, w.reshape(7, 7, 1, C), (1, 1), [(3, 3), (3, 3)],
            dimension_numbers=("NHWC", "HWIO", "NHWC"),
            feature_group_count=C) + b

    h = dwconv(x, p["w_dw1"], p["b_dw1"])
    x1 = jnp.einsum("nhwc,cd->nhwd", h, p["w_f1"]) + p["b_f1"]
    x2 = jnp.einsum("nhwc,cd->nhwd", h, p["w_f2"]) + p["b_f2"]
    t = jnp.maximum(x1, 0.0) * x2
    g = jnp.einsum("nhwd,dc->nhwc", t, p["w_g"]) + p["b_g"]
    h2 = dwconv(g, p["w_dw2"], p["b_dw2"])
    return x + h2


if __name__ == "__main__":
    # Block(dim=8), mlp_ratio=3; W*C = 128 -> fully lane-dense minor dim.
    # N=8 lets the batch tiler pick B_TILE=4 (M=64 rows/step) with 2 grid steps.
    N, C, H, W = 8, 8, 16, 16
    params = make_params(dim=C, mlp_ratio=3, seed=0)

    # One-time weight re-expression, hoisted out of the jitted forward.
    ldp = prepare_lane_dense_params(params, W)
    ldp = jax.tree_util.tree_map(jax.block_until_ready, ldp)

    x_nchw = jax.random.normal(jax.random.PRNGKey(0), (N, C, H, W), jnp.float32)

    y = jax.block_until_ready(block_forward_nchw(x_nchw, ldp))

    # Correctness vs the pure-JAX f32 reference.  The kernel runs the MXU with
    # bf16 operands (f32 accumulation), so the tolerance is bf16-level.
    x_nhwc = jnp.transpose(x_nchw, (0, 2, 3, 1))
    y_ref = jnp.transpose(ref_block_nhwc(x_nhwc, params), (0, 3, 1, 2))
    assert y.shape == x_nchw.shape and y.dtype == jnp.float32
    assert jnp.allclose(y, y_ref, atol=1e-2, rtol=1e-2), "mismatch vs reference"

    print("KERNEL_OK")
</pallas_src>

<mosaic_0001>
module attributes {stable_mosaic.version = 11 : i64} {
  func.func @_block_kernel(%arg0: i32, %arg1: memref<4x16x128xf32, #tpu.memory_space<vmem>>, %arg2: memref<896x128xbf16, #tpu.memory_space<vmem>>, %arg3: memref<128x768xbf16, #tpu.memory_space<vmem>>, %arg4: memref<1x768xf32, #tpu.memory_space<vmem>>, %arg5: memref<384x128xbf16, #tpu.memory_space<vmem>>, %arg6: memref<1x128xf32, #tpu.memory_space<vmem>>, %arg7: memref<896x128xbf16, #tpu.memory_space<vmem>>, %arg8: memref<1x128xf32, #tpu.memory_space<vmem>>, %arg9: memref<4x16x128xf32, #tpu.memory_space<vmem>>) attributes {dimension_semantics = [#tpu.dimension_semantics<parallel>], iteration_bounds = array<i64: 2>, scalar_prefetch = 0 : i64, scratch_operands = 0 : i64, tpu.core_type = #tpu.core_type<tc>, window_params = [{transform_indices = @transform_0, window_bounds = array<i64: 4, 16, 128>}, {pipeline_mode = #tpu.pipeline_mode<synchronous>, transform_indices = @transform_1, window_bounds = array<i64: 896, 128>}, {pipeline_mode = #tpu.pipeline_mode<synchronous>, transform_indices = @transform_2, window_bounds = array<i64: 128, 768>}, {pipeline_mode = #tpu.pipeline_mode<synchronous>, transform_indices = @transform_3, window_bounds = array<i64: 1, 768>}, {pipeline_mode = #tpu.pipeline_mode<synchronous>, transform_indices = @transform_4, window_bounds = array<i64: 384, 128>}, {pipeline_mode = #tpu.pipeline_mode<synchronous>, transform_indices = @transform_5, window_bounds = array<i64: 1, 128>}, {pipeline_mode = #tpu.pipeline_mode<synchronous>, transform_indices = @transform_6, window_bounds = array<i64: 896, 128>}, {pipeline_mode = #tpu.pipeline_mode<synchronous>, transform_indices = @transform_7, window_bounds = array<i64: 1, 128>}, {transform_indices = @transform_8, window_bounds = array<i64: 4, 16, 128>}]} {
    %c0 = arith.constant 0 : index
    %c0_0 = arith.constant 0 : index
    %c0_1 = arith.constant 0 : index
    %0 = vector.load %arg1[%c0, %c0_0, %c0_1] : memref<4x16x128xf32, #tpu.memory_space<vmem>>, vector<4x16x128xf32>
    %1 = vector.shape_cast %0 : vector<4x16x128xf32> to vector<64x128xf32>
    %2 = tpu.iota {dimensions = array<i32: 0>} : vector<64x1xi32>
    %c16_i32 = arith.constant 16 : i32
    %c0_i32 = arith.constant 0 : i32
    %3 = arith.cmpi eq, %c16_i32, %c0_i32 : i32
    %c1_i32 = arith.constant 1 : i32
    %4 = arith.select %3, %c1_i32, %c16_i32 : i32
    %5 = vector.broadcast %4 : i32 to vector<64x1xi32>
    %6 = arith.remsi %2, %5 : vector<64x1xi32>
    %c0_i32_2 = arith.constant 0 : i32
    %7 = vector.broadcast %c0_i32_2 : i32 to vector<64x1xi32>
    %8 = arith.cmpi ne, %6, %7 : vector<64x1xi32>
    %c0_i32_3 = arith.constant 0 : i32
    %9 = vector.broadcast %c0_i32_3 : i32 to vector<64x1xi32>
    %10 = arith.cmpi slt, %6, %9 : vector<64x1xi32>
    %c0_i32_4 = arith.constant 0 : i32
    %11 = arith.cmpi slt, %4, %c0_i32_4 : i32
    %12 = vector.broadcast %11 : i1 to vector<64x1xi1>
    %13 = vector.broadcast %12 : vector<64x1xi1> to vector<64x1xi1>
    %14 = arith.xori %10, %13 : vector<64x1xi1>
    %15 = arith.andi %14, %8 : vector<64x1xi1>
    %16 = vector.broadcast %4 : i32 to vector<64x1xi32>
    %17 = arith.addi %6, %16 : vector<64x1xi32>
    %18 = arith.select %15, %17, %6 : vector<64x1xi1>, vector<64x1xi32>
    %c3_i32 = arith.constant 3 : i32
    %19 = tpu.dynamic_rotate %1 by %c3_i32 dim 0 : vector<64x128xf32>, i32 -> vector<64x128xf32>
    %c3_i32_5 = arith.constant 3 : i32
    %20 = vector.broadcast %c3_i32_5 : i32 to vector<64x1xi32>
    %21 = arith.cmpi sge, %18, %20 : vector<64x1xi32>
    %cst = arith.constant 0.000000e+00 : f32
    %22 = vector.shape_cast %21 : vector<64x1xi1> to vector<64x1xi1>
    %23 = vector.broadcast %22 : vector<64x1xi1> to vector<64x128xi1>
    %24 = vector.broadcast %cst : f32 to vector<64x128xf32>
    %25 = arith.select %23, %19, %24 : vector<64x128xi1>, vector<64x128xf32>
    %26 = arith.truncf %25 : vector<64x128xf32> to vector<64x128xbf16>
    %c2_i32 = arith.constant 2 : i32
    %27 = tpu.dynamic_rotate %1 by %c2_i32 dim 0 : vector<64x128xf32>, i32 -> vector<64x128xf32>
    %c2_i32_6 = arith.constant 2 : i32
    %28 = vector.broadcast %c2_i32_6 : i32 to vector<64x1xi32>
    %29 = arith.cmpi sge, %18, %28 : vector<64x1xi32>
    %cst_7 = arith.constant 0.000000e+00 : f32
    %30 = vector.shape_cast %29 : vector<64x1xi1> to vector<64x1xi1>
    %31 = vector.broadcast %30 : vector<64x1xi1> to vector<64x128xi1>
    %32 = vector.broadcast %cst_7 : f32 to vector<64x128xf32>
    %33 = arith.select %31, %27, %32 : vector<64x128xi1>, vector<64x128xf32>
    %34 = arith.truncf %33 : vector<64x128xf32> to vector<64x128xbf16>
    %c1_i32_8 = arith.constant 1 : i32
    %35 = tpu.dynamic_rotate %1 by %c1_i32_8 dim 0 : vector<64x128xf32>, i32 -> vector<64x128xf32>
    %c1_i32_9 = arith.constant 1 : i32
    %36 = vector.broadcast %c1_i32_9 : i32 to vector<64x1xi32>
    %37 = arith.cmpi sge, %18, %36 : vector<64x1xi32>
    %cst_10 = arith.constant 0.000000e+00 : f32
    %38 = vector.shape_cast %37 : vector<64x1xi1> to vector<64x1xi1>
    %39 = vector.broadcast %38 : vector<64x1xi1> to vector<64x128xi1>
    %40 = vector.broadcast %cst_10 : f32 to vector<64x128xf32>
    %41 = arith.select %39, %35, %40 : vector<64x128xi1>, vector<64x128xf32>
    %42 = arith.truncf %41 : vector<64x128xf32> to vector<64x128xbf16>
    %43 = arith.truncf %1 : vector<64x128xf32> to vector<64x128xbf16>
    %c63_i32 = arith.constant 63 : i32
    %44 = tpu.dynamic_rotate %1 by %c63_i32 dim 0 : vector<64x128xf32>, i32 -> vector<64x128xf32>
    %c15_i32 = arith.constant 15 : i32
    %45 = vector.broadcast %c15_i32 : i32 to vector<64x1xi32>
    %46 = arith.cmpi slt, %18, %45 : vector<64x1xi32>
    %cst_11 = arith.constant 0.000000e+00 : f32
    %47 = vector.shape_cast %46 : vector<64x1xi1> to vector<64x1xi1>
    %48 = vector.broadcast %47 : vector<64x1xi1> to vector<64x128xi1>
    %49 = vector.broadcast %cst_11 : f32 to vector<64x128xf32>
    %50 = arith.select %48, %44, %49 : vector<64x128xi1>, vector<64x128xf32>
    %51 = arith.truncf %50 : vector<64x128xf32> to vector<64x128xbf16>
    %c62_i32 = arith.constant 62 : i32
    %52 = tpu.dynamic_rotate %1 by %c62_i32 dim 0 : vector<64x128xf32>, i32 -> vector<64x128xf32>
    %c14_i32 = arith.constant 14 : i32
    %53 = vector.broadcast %c14_i32 : i32 to vector<64x1xi32>
    %54 = arith.cmpi slt, %18, %53 : vector<64x1xi32>
    %cst_12 = arith.constant 0.000000e+00 : f32
    %55 = vector.shape_cast %54 : vector<64x1xi1> to vector<64x1xi1>
    %56 = vector.broadcast %55 : vector<64x1xi1> to vector<64x128xi1>
    %57 = vector.broadcast %cst_12 : f32 to vector<64x128xf32>
    %58 = arith.select %56, %52, %57 : vector<64x128xi1>, vector<64x128xf32>
    %59 = arith.truncf %58 : vector<64x128xf32> to vector<64x128xbf16>
    %c61_i32 = arith.constant 61 : i32
    %60 = tpu.dynamic_rotate %1 by %c61_i32 dim 0 : vector<64x128xf32>, i32 -> vector<64x128xf32>
    %c13_i32 = arith.constant 13 : i32
    %61 = vector.broadcast %c13_i32 : i32 to vector<64x1xi32>
    %62 = arith.cmpi slt, %18, %61 : vector<64x1xi32>
    %cst_13 = arith.constant 0.000000e+00 : f32
    %63 = vector.shape_cast %62 : vector<64x1xi1> to vector<64x1xi1>
    %64 = vector.broadcast %63 : vector<64x1xi1> to vector<64x128xi1>
    %65 = vector.broadcast %cst_13 : f32 to vector<64x128xf32>
    %66 = arith.select %64, %60, %65 : vector<64x128xi1>, vector<64x128xf32>
    %67 = arith.truncf %66 : vector<64x128xf32> to vector<64x128xbf16>
    %68 = tpu.concatenate %26, %34, %42, %43, %51, %59, %67 in 1 : vector<64x128xbf16>, vector<64x128xbf16>, vector<64x128xbf16>, vector<64x128xbf16>, vector<64x128xbf16>, vector<64x128xbf16>, vector<64x128xbf16> -> vector<64x896xbf16>
    %c0_14 = arith.constant 0 : index
    %c0_15 = arith.constant 0 : index
    %69 = vector.load %arg2[%c0_14, %c0_15] : memref<896x128xbf16, #tpu.memory_space<vmem>>, vector<896x128xbf16>
    %cst_16 = arith.constant dense<0.000000e+00> : vector<64x128xf32>
    %70 = tpu.matmul %68, %69, %cst_16 {dimension_numbers = #tpu.dot_dimension_numbers<[1], [0], [0], [1], [0, 0, 1, 1], [], []>} : vector<64x896xbf16>, vector<896x128xbf16>, vector<64x128xf32> -> vector<64x128xf32>
    %71 = arith.truncf %70 : vector<64x128xf32> to vector<64x128xbf16>
    %c0_17 = arith.constant 0 : index
    %c0_18 = arith.constant 0 : index
    %72 = vector.load %arg3[%c0_17, %c0_18] : memref<128x768xbf16, #tpu.memory_space<vmem>>, vector<128x768xbf16>
    %cst_19 = arith.constant dense<0.000000e+00> : vector<64x768xf32>
    %73 = tpu.matmul %71, %72, %cst_19 {dimension_numbers = #tpu.dot_dimension_numbers<[1], [0], [0], [1], [0, 0, 1, 1], [], []>} : vector<64x128xbf16>, vector<128x768xbf16>, vector<64x768xf32> -> vector<64x768xf32>
    %c0_20 = arith.constant 0 : index
    %c0_21 = arith.constant 0 : index
    %74 = vector.load %arg4[%c0_20, %c0_21] : memref<1x768xf32, #tpu.memory_space<vmem>>, vector<1x768xf32>
    %75 = vector.broadcast %74 : vector<1x768xf32> to vector<64x768xf32>
    %76 = arith.addf %73, %75 : vector<64x768xf32>
    %77 = vector.extract_strided_slice %76 {offsets = [0, 0], sizes = [64, 384], strides = [1, 1]} : vector<64x768xf32> to vector<64x384xf32>
    %cst_22 = arith.constant 0.000000e+00 : f32
    %78 = vector.broadcast %cst_22 : f32 to vector<64x384xf32>
    %79 = arith.maximumf %77, %78 : vector<64x384xf32>
    %80 = vector.extract_strided_slice %76 {offsets = [0, 384], sizes = [64, 384], strides = [1, 1]} : vector<64x768xf32> to vector<64x384xf32>
    %81 = arith.mulf %79, %80 : vector<64x384xf32>
    %82 = arith.truncf %81 : vector<64x384xf32> to vector<64x384xbf16>
    %c0_23 = arith.constant 0 : index
    %c0_24 = arith.constant 0 : index
    %83 = vector.load %arg5[%c0_23, %c0_24] : memref<384x128xbf16, #tpu.memory_space<vmem>>, vector<384x128xbf16>
    %cst_25 = arith.constant dense<0.000000e+00> : vector<64x128xf32>
    %84 = tpu.matmul %82, %83, %cst_25 {dimension_numbers = #tpu.dot_dimension_numbers<[1], [0], [0], [1], [0, 0, 1, 1], [], []>} : vector<64x384xbf16>, vector<384x128xbf16>, vector<64x128xf32> -> vector<64x128xf32>
    %c0_26 = arith.constant 0 : index
    %c0_27 = arith.constant 0 : index
    %85 = vector.load %arg6[%c0_26, %c0_27] : memref<1x128xf32, #tpu.memory_space<vmem>>, vector<1x128xf32>
    %86 = vector.broadcast %85 : vector<1x128xf32> to vector<64x128xf32>
    %87 = arith.addf %84, %86 : vector<64x128xf32>
    %c3_i32_28 = arith.constant 3 : i32
    %88 = tpu.dynamic_rotate %87 by %c3_i32_28 dim 0 : vector<64x128xf32>, i32 -> vector<64x128xf32>
    %c3_i32_29 = arith.constant 3 : i32
    %89 = vector.broadcast %c3_i32_29 : i32 to vector<64x1xi32>
    %90 = arith.cmpi sge, %18, %89 : vector<64x1xi32>
    %cst_30 = arith.constant 0.000000e+00 : f32
    %91 = vector.shape_cast %90 : vector<64x1xi1> to vector<64x1xi1>
    %92 = vector.broadcast %91 : vector<64x1xi1> to vector<64x128xi1>
    %93 = vector.broadcast %cst_30 : f32 to vector<64x128xf32>
    %94 = arith.select %92, %88, %93 : vector<64x128xi1>, vector<64x128xf32>
    %95 = arith.truncf %94 : vector<64x128xf32> to vector<64x128xbf16>
    %c2_i32_31 = arith.constant 2 : i32
    %96 = tpu.dynamic_rotate %87 by %c2_i32_31 dim 0 : vector<64x128xf32>, i32 -> vector<64x128xf32>
    %c2_i32_32 = arith.constant 2 : i32
    %97 = vector.broadcast %c2_i32_32 : i32 to vector<64x1xi32>
    %98 = arith.cmpi sge, %18, %97 : vector<64x1xi32>
    %cst_33 = arith.constant 0.000000e+00 : f32
    %99 = vector.shape_cast %98 : vector<64x1xi1> to vector<64x1xi1>
    %100 = vector.broadcast %99 : vector<64x1xi1> to vector<64x128xi1>
    %101 = vector.broadcast %cst_33 : f32 to vector<64x128xf32>
    %102 = arith.select %100, %96, %101 : vector<64x128xi1>, vector<64x128xf32>
    %103 = arith.truncf %102 : vector<64x128xf32> to vector<64x128xbf16>
    %c1_i32_34 = arith.constant 1 : i32
    %104 = tpu.dynamic_rotate %87 by %c1_i32_34 dim 0 : vector<64x128xf32>, i32 -> vector<64x128xf32>
    %c1_i32_35 = arith.constant 1 : i32
    %105 = vector.broadcast %c1_i32_35 : i32 to vector<64x1xi32>
    %106 = arith.cmpi sge, %18, %105 : vector<64x1xi32>
    %cst_36 = arith.constant 0.000000e+00 : f32
    %107 = vector.shape_cast %106 : vector<64x1xi1> to vector<64x1xi1>
    %108 = vector.broadcast %107 : vector<64x1xi1> to vector<64x128xi1>
    %109 = vector.broadcast %cst_36 : f32 to vector<64x128xf32>
    %110 = arith.select %108, %104, %109 : vector<64x128xi1>, vector<64x128xf32>
    %111 = arith.truncf %110 : vector<64x128xf32> to vector<64x128xbf16>
    %112 = arith.truncf %87 : vector<64x128xf32> to vector<64x128xbf16>
    %c63_i32_37 = arith.constant 63 : i32
    %113 = tpu.dynamic_rotate %87 by %c63_i32_37 dim 0 : vector<64x128xf32>, i32 -> vector<64x128xf32>
    %c15_i32_38 = arith.constant 15 : i32
    %114 = vector.broadcast %c15_i32_38 : i32 to vector<64x1xi32>
    %115 = arith.cmpi slt, %18, %114 : vector<64x1xi32>
    %cst_39 = arith.constant 0.000000e+00 : f32
    %116 = vector.shape_cast %115 : vector<64x1xi1> to vector<64x1xi1>
    %117 = vector.broadcast %116 : vector<64x1xi1> to vector<64x128xi1>
    %118 = vector.broadcast %cst_39 : f32 to vector<64x128xf32>
    %119 = arith.select %117, %113, %118 : vector<64x128xi1>, vector<64x128xf32>
    %120 = arith.truncf %119 : vector<64x128xf32> to vector<64x128xbf16>
    %c62_i32_40 = arith.constant 62 : i32
    %121 = tpu.dynamic_rotate %87 by %c62_i32_40 dim 0 : vector<64x128xf32>, i32 -> vector<64x128xf32>
    %c14_i32_41 = arith.constant 14 : i32
    %122 = vector.broadcast %c14_i32_41 : i32 to vector<64x1xi32>
    %123 = arith.cmpi slt, %18, %122 : vector<64x1xi32>
    %cst_42 = arith.constant 0.000000e+00 : f32
    %124 = vector.shape_cast %123 : vector<64x1xi1> to vector<64x1xi1>
    %125 = vector.broadcast %124 : vector<64x1xi1> to vector<64x128xi1>
    %126 = vector.broadcast %cst_42 : f32 to vector<64x128xf32>
    %127 = arith.select %125, %121, %126 : vector<64x128xi1>, vector<64x128xf32>
    %128 = arith.truncf %127 : vector<64x128xf32> to vector<64x128xbf16>
    %c61_i32_43 = arith.constant 61 : i32
    %129 = tpu.dynamic_rotate %87 by %c61_i32_43 dim 0 : vector<64x128xf32>, i32 -> vector<64x128xf32>
    %c13_i32_44 = arith.constant 13 : i32
    %130 = vector.broadcast %c13_i32_44 : i32 to vector<64x1xi32>
    %131 = arith.cmpi slt, %18, %130 : vector<64x1xi32>
    %cst_45 = arith.constant 0.000000e+00 : f32
    %132 = vector.shape_cast %131 : vector<64x1xi1> to vector<64x1xi1>
    %133 = vector.broadcast %132 : vector<64x1xi1> to vector<64x128xi1>
    %134 = vector.broadcast %cst_45 : f32 to vector<64x128xf32>
    %135 = arith.select %133, %129, %134 : vector<64x128xi1>, vector<64x128xf32>
    %136 = arith.truncf %135 : vector<64x128xf32> to vector<64x128xbf16>
    %137 = tpu.concatenate %95, %103, %111, %112, %120, %128, %136 in 1 : vector<64x128xbf16>, vector<64x128xbf16>, vector<64x128xbf16>, vector<64x128xbf16>, vector<64x128xbf16>, vector<64x128xbf16>, vector<64x128xbf16> -> vector<64x896xbf16>
    %c0_46 = arith.constant 0 : index
    %c0_47 = arith.constant 0 : index
    %138 = vector.load %arg7[%c0_46, %c0_47] : memref<896x128xbf16, #tpu.memory_space<vmem>>, vector<896x128xbf16>
    %cst_48 = arith.constant dense<0.000000e+00> : vector<64x128xf32>
    %139 = tpu.matmul %137, %138, %cst_48 {dimension_numbers = #tpu.dot_dimension_numbers<[1], [0], [0], [1], [0, 0, 1, 1], [], []>} : vector<64x896xbf16>, vector<896x128xbf16>, vector<64x128xf32> -> vector<64x128xf32>
    %140 = arith.addf %1, %139 : vector<64x128xf32>
    %c0_49 = arith.constant 0 : index
    %c0_50 = arith.constant 0 : index
    %141 = vector.load %arg8[%c0_49, %c0_50] : memref<1x128xf32, #tpu.memory_space<vmem>>, vector<1x128xf32>
    %142 = vector.broadcast %141 : vector<1x128xf32> to vector<64x128xf32>
    %143 = arith.addf %140, %142 : vector<64x128xf32>
    %144 = vector.shape_cast %143 : vector<64x128xf32> to vector<4x16x128xf32>
    %c0_51 = arith.constant 0 : index
    %c0_52 = arith.constant 0 : index
    %c0_53 = arith.constant 0 : index
    %145 = vector.load %arg9[%c0_51, %c0_52, %c0_53] : memref<4x16x128xf32, #tpu.memory_space<vmem>>, vector<4x16x128xf32>
    tpu.vector_store %arg9[%c0_51, %c0_52, %c0_53], %144 {strides = array<i32>} : memref<4x16x128xf32, #tpu.memory_space<vmem>>, vector<4x16x128xf32>,
    return
  }
  func.func @transform_0(%arg0: i32) -> (i32, i32, i32) {
    %c0_i32 = arith.constant 0 : i32
    %c0_i32_0 = arith.constant 0 : i32
    %c0_i32_1 = arith.constant 0 : i32
    return %arg0, %c0_i32, %c0_i32_0 : i32, i32, i32
  }
  func.func @transform_1(%arg0: i32) -> (i32, i32) {
    %c0_i32 = arith.constant 0 : i32
    %c0_i32_0 = arith.constant 0 : i32
    %c0_i32_1 = arith.constant 0 : i32
    return %c0_i32, %c0_i32_0 : i32, i32
  }
  func.func @transform_2(%arg0: i32) -> (i32, i32) {
    %c0_i32 = arith.constant 0 : i32
    %c0_i32_0 = arith.constant 0 : i32
    %c0_i32_1 = arith.constant 0 : i32
    return %c0_i32, %c0_i32_0 : i32, i32
  }
  func.func @transform_3(%arg0: i32) -> (i32, i32) {
    %c0_i32 = arith.constant 0 : i32
    %c0_i32_0 = arith.constant 0 : i32
    %c0_i32_1 = arith.constant 0 : i32
    return %c0_i32, %c0_i32_0 : i32, i32
  }
  func.func @transform_4(%arg0: i32) -> (i32, i32) {
    %c0_i32 = arith.constant 0 : i32
    %c0_i32_0 = arith.constant 0 : i32
    %c0_i32_1 = arith.constant 0 : i32
    return %c0_i32, %c0_i32_0 : i32, i32
  }
  func.func @transform_5(%arg0: i32) -> (i32, i32) {
    %c0_i32 = arith.constant 0 : i32
    %c0_i32_0 = arith.constant 0 : i32
    %c0_i32_1 = arith.constant 0 : i32
    return %c0_i32, %c0_i32_0 : i32, i32
  }
  func.func @transform_6(%arg0: i32) -> (i32, i32) {
    %c0_i32 = arith.constant 0 : i32
    %c0_i32_0 = arith.constant 0 : i32
    %c0_i32_1 = arith.constant 0 : i32
    return %c0_i32, %c0_i32_0 : i32, i32
  }
  func.func @transform_7(%arg0: i32) -> (i32, i32) {
    %c0_i32 = arith.constant 0 : i32
    %c0_i32_0 = arith.constant 0 : i32
    %c0_i32_1 = arith.constant 0 : i32
    return %c0_i32, %c0_i32_0 : i32, i32
  }
  func.func @transform_8(%arg0: i32) -> (i32, i32, i32) {
    %c0_i32 = arith.constant 0 : i32
    %c0_i32_0 = arith.constant 0 : i32
    %c0_i32_1 = arith.constant 0 : i32
    return %arg0, %c0_i32, %c0_i32_0 : i32, i32, i32
  }
}

</mosaic_0001>

<bundles_post_ra>
// kernel: block_forward_lane_dense.1
= control target key start
LH: loop header
LB: loop body
LE: loop exit
PB: predicated region body
PF: predicated region fallthrough
CT: control target
= control target key end

     0   :  { %s6083_s0 = inlined_call_operand.hbm [shape: f32[8,16,128], index: 0, kind: input, shape index: {}, may-alias: {0,8}]   ;;  %s6084_s1 = inlined_call_operand.hbm [shape: bf16[896,128], index: 1, kind: input, shape index: {}]   ;;  %s6085_s2 = inlined_call_operand.hbm [shape: bf16[128,768], index: 2, kind: input, shape index: {}]   ;;  %s6086_s3 = inlined_call_operand.vmem [shape: f32[1,768], index: 3, kind: input, shape index: {}]   ;;  %s6087_s4 = inlined_call_operand.vmem [shape: bf16[384,128], index: 4, kind: input, shape index: {}]   ;;  %s6088_s5 = inlined_call_operand.vmem [shape: f32[1,128], index: 5, kind: input, shape index: {}]   ;;  %s6089_s6 = inlined_call_operand.hbm [shape: bf16[896,128], index: 6, kind: input, shape index: {}]   ;;  %s6090_s7 = inlined_call_operand.vmem [shape: f32[1,128], index: 7, kind: input, shape index: {}]   ;;  %s6091_s8 = inlined_call_operand.hbm [shape: f32[8,16,128], index: 8, kind: output, shape index: {}, may-alias: {0,8}]  }
   0x1   :  { %6131 = sst [smem:[#allocation29_spill]] %s6084_s1 }
   0x2   :  { %6132 = sst [smem:[#allocation30_spill]] %s6085_s2 }
   0x3   :  { %13 = vsyncpa [#allocation3], 0 }
   0x4   :  { %15 = vsyncpa [#allocation3 + $0x1], 0 }
   0x5   :  { %16 = vsyncpa [#allocation6], 0 }
   0x6   :  { %17 = vsyncpa [#allocation9], 0 }
   0x7   :  { %18 = vsyncpa [#allocation4], 0 }
   0x8   :  { %20 = vsyncpa [#allocation4 + $0x1], 0  ;;  %s4778_s27 = smov 0   ;;  %s4780_s28 = smov 0  }
   0x9   :  { %s4782_s29 = smov 0   ;;  %s4784_s30 = smov 0  }
   0xa LB: > { %s4799_s9 = sadd.s32 4294967295, %s4716_s30   ;;  %s3475_s10 = sadd.s32 4294967294, %s4716_s30   ;;  %s4716_s30 = sphi %s4784_s30, %s6320_s30   ;;  %s4712_s29 = sphi %s4782_s29, %s6319_s29   ;;  %s4708_s28 = sphi %s4780_s28, %s6318_s28   ;;  %s4704_s27 = sphi %s4778_s27, %s6317_s27  }
   0xb   : > { %p46_p0 = scmp.ne.s32.totalorder %s4708_s28, %s4704_s27  ;;  %p6092_p1 = scmp.eq.s32.totalorder %s4799_s9, 0 }
   0xc   : > { %p217_p2 = scmp.eq.s32.totalorder %s4799_s9, 1  ;;  %p223_p3 = scmp.eq.s32.totalorder %s3475_s10, 1 }
   0xd   : > { %p4808_p4 = por %p6092_p1, %p46_p0  ;;  %p3476_p5 = scmp.ge.s32.totalorder %s4716_s30, 1 }
   0xe   : > { %p4813_p6 = por %p223_p3, %p46_p0  ;;  %p230_p7 = scmp.lt.s32.totalorder %s4716_s30, 3 }
   0xf   : > { %s6133_s11 = scalar_select %p4808_p4, 1, 0 }
  0x10   : > { %s6134_s12 = scalar_select %p4813_p6, 1, 0 }
  0x11   : > { %p4818_p8 = pnand %p3476_p5, %p230_p7  ;;  %s4718_s14 = smov [#allocation5]  }
  0x12   : > { %s242_s15 = sshll.u32 %s4718_s14, 4  ;;  %s4719_s17 = smov [#allocation7]   ;;  %s243_s15 = int_to_ptr.vmem [resolvable:$true] %s242_s15 }
  0x13   : > { %s6135_s13 = scalar_select %p4818_p8, 1, 0 }
  0x14   : > { %p4251_p9 = pneg %p4818_p8  ;;  %s255_s18 = sshll.u32 %s4719_s17, 4  ;;  %s256_s18 = int_to_ptr.vmem [resolvable:$true] %s255_s18 }
  0x15   : > { %s4549_s19 = scalar_lea.vmem %s243_s15, 7168  ;;  %p4557_p5 = scmp.lt.s32.totalorder %s243_s15, %s243_s15 }
  0x16   : > { %p4827_p11 = pnand %p4251_p9, %p6092_p1  ;;  %p4550_p13 = scmp.ne.s32.totalorder %s243_s15, %s4549_s19 }
  0x17   : > { %p4558_p7 = scmp.lt.s32.totalorder %s4549_s19, %s4549_s19 }
  0x18   : > { %p4540_p12 = pneg %p4827_p11 }
  0x19   : > { %p4559_p10 = por %p4558_p7, %p4557_p5 }
  0x1a   : > { %p4552_p0 = pnand %p4550_p13, %p4540_p12 }
  0x1c   : > { %p4553_p3 = pneg %p4552_p0 }
  0x1e   : > { %p4560_p9 = pnand %p4559_p10, %p4553_p3 }
  0x20   : > { %4563 = shalt.err (!%p4560_p9)
}
  0x21   : > { %s4720_s20 = smov 64   ;;  %s4721_s21 = smov 4  }
  0x22   : > { %s6137_s1 = sld [smem:[#allocation29_spill]]  ;;  %s4575_s24 = scalar_lea.vmem %s256_s18, 6144 }
  0x23   : > { %p4576_p13 = scmp.ne.s32.totalorder %s256_s18, %s4575_s24  ;;  %p4583_p10 = scmp.lt.s32.totalorder %s256_s18, %s256_s18 }
  0x24   : > { %p4584_p3 = scmp.lt.s32.totalorder %s4575_s24, %s4575_s24 }
  0x25   : > { %p4578_p0 = pnand %p4576_p13, %p4540_p12 }
  0x26   : > { %p4585_p7 = por %p4584_p3, %p4583_p10 }
  0x27   : > { %p4579_p5 = pneg %p4578_p0 }
  0x28   : > { %4254 = dma.hbm_to_vmem [thread:$0]  (!%p4827_p11), %s6137_s1, 7168, %s243_s15, [#allocation6], %s4720_s20, %s4720_s20, %s4721_s21  }
  0x29   : > { %p4586_p9 = pnand %p4585_p7, %p4579_p5 }
  0x2b   : > { %4589 = shalt.err (!%p4586_p9)
}
  0x2c   : > { %s4722_s25 = smov 384   ;;  %s4723_s26 = smov 24  }
  0x2d   : > { %s6138_s2 = sld [smem:[#allocation30_spill]]  ;;  %s4724_s15 = smov [#allocation8]  }
  0x2e   : > { %s277_s17 = sshll.u32 %s4724_s15, 4  ;;  %s4853_s19 = sadd.s32 1, %s4716_s30   ;;  %s278_s17 = int_to_ptr.vmem [resolvable:$true] %s277_s17 }
  0x2f   : > { %s4601_s22 = scalar_lea.vmem %s278_s17, 7168  ;;  %p4609_p10 = scmp.lt.s32.totalorder %s278_s17, %s278_s17 }
  0x30   : > { %p4602_p13 = scmp.ne.s32.totalorder %s278_s17, %s4601_s22  ;;  %p4610_p3 = scmp.lt.s32.totalorder %s4601_s22, %s4601_s22 }
  0x32   : > { %p4604_p0 = pnand %p4602_p13, %p4540_p12  ;;  %p4611_p7 = por %p4610_p3, %p4609_p10 }
  0x33   : > { %4257 = dma.hbm_to_vmem [thread:$0]  (!%p4827_p11), %s6138_s2, 6144, %s256_s18, [#allocation6], %s4722_s25, %s4722_s25, %s4723_s26  }
  0x34   : > { %p4605_p5 = pneg %p4604_p0 }
  0x36   : > { %p4612_p9 = pnand %p4611_p7, %p4605_p5 }
  0x38   : > { %4615 = shalt.err (!%p4612_p9)
}
  0x39   : > { %4260 = dma.hbm_to_vmem [thread:$0]  (!%p4827_p11), %s6089_s6, 7168, %s278_s17, [#allocation9], %s4720_s20, %s4720_s20, %s4721_s21  }
  0x3a   : > { %s30_s24 = ssub.s32 %s4716_s30, %s4853_s19  ;;  %s33_s16 = sadd.s32 1, %s4712_s29 }
  0x3b   : > { %p31_p12 = scmp.eq.s32.totalorder %s30_s24, 0  ;;  %p40_p13 = scmp.ne.s32.totalorder %s4712_s29, %s4708_s28 }
  0x3c   : > { %p41_p0 = scmp.eq.s32.totalorder %s4716_s30, 0  ;;  %p4272_p5 = scmp.lt.s32.totalorder %s4716_s30, 2 }
  0x3d   : > { %s4874_s25 = scalar_select %p31_p12, %s4712_s29, %s33_s16  }
  0x3e   : > { %p42_p10 = por %p41_p0, %p40_p13  ;;  %p4878_p3 = por %p217_p2, %p40_p13 }
  0x3f   : > { %s294_s10 = sand.u32 1, %s4712_s29   ;;  %s3828_s14 = sshll.u32 %s4716_s30, 10 }
  0x40   : > { %s6139_s26 = scalar_select %p4878_p3, 1, 0 }
  0x41   : > { %s3481_s15 = sshll.u32 %s294_s10, 6  ;;  %s4887_s20 = scalar_lea.hbm %s6083_s0, %s3828_s14 }
  0x42   : > { %s298_s21 = scalar_lea.vmem [#allocation2], %s3481_s15  ;;  %p4889_p11 = pnand %p4272_p5, %p42_p10 }
  0x43   : > { %s306_s17 = sshll.u32 %s298_s21, 4  ;;  %s4895_s24 = scalar_lea.sflag [#allocation3], %s294_s10  ;;  %s4893_s17 = int_to_ptr.vmem [resolvable:$true] %s306_s17 }
  0x44   : > { %s4616_s16 = scalar_lea.hbm %s4887_s20, 1024  ;;  %p4618_p7 = pneg %p4889_p11 }
  0x45   : > { %p4617_p2 = scmp.ne.s32.totalorder %s4887_s20, %s4616_s16  ;;  %s4621_s15 = scalar_lea.hbm %s6083_s0, 2048 }
  0x46   : > { %p4622_p13 = scmp.lt.s32.totalorder %s4887_s20, %s6083_s0  ;;  %p4623_p0 = scmp.lt.s32.totalorder %s4621_s15, %s4616_s16 }
  0x47   : > { %p4619_p9 = pnand %p4618_p7, %p4617_p2 }
  0x48   : > { %p4624_p5 = por %p4623_p0, %p4622_p13 }
  0x49   : > { %p4620_p12 = pneg %p4619_p9 }
  0x4b   : > { %p4625_p10 = pnand %p4624_p5, %p4620_p12 }
  0x4d   : > { %4628 = shalt.err (!%p4625_p10)
}
  0x4e   : > { %s4629_s10 = scalar_lea.vmem %s4893_s17, 1024  ;;  %s4725_s1 = smov [#allocation2]  }
  0x4f   : > { %p4630_p1 = scmp.ne.s32.totalorder %s4893_s17, %s4629_s10  ;;  %s4634_s2 = sshll.u32 %s4725_s1, 4  ;;  %s4635_s2 = int_to_ptr.vmem [resolvable:$false] %s4634_s2 }
  0x50   : > { %s4636_s14 = scalar_lea.vmem %s4635_s2, 2048  ;;  %p4637_p9 = scmp.lt.s32.totalorder %s4893_s17, %s4635_s2 }
  0x51   : > { %p4632_p6 = pnand %p4630_p1, %p4618_p7  ;;  %p4638_p3 = scmp.lt.s32.totalorder %s4636_s14, %s4629_s10 }
  0x53   : > { %p4633_p2 = pneg %p4632_p6  ;;  %p4639_p4 = por %p4638_p3, %p4637_p9 }
  0x55   : > { %p4640_p8 = pnand %p4639_p4, %p4633_p2 }
  0x57   : > { %4643 = shalt.err (!%p4640_p8)
}
  0x58   : > { %s4726_s16 = smov 128   ;;  %s4727_s22 = smov 8  }
  0x59   : > { %4264 = dma.hbm_to_vmem [thread:$0]  (!%p4889_p11), %s4887_s20, 1024, %s4893_s17, %s4895_s24, %s4726_s16, %s4726_s16, %s4727_s22  }
  0x5a   : > { %p6141_p1 = scmp.ne.s32.totalorder %s6135_s13, 0 }
  0x5c   : > { %318 = sbr.rel (%p6141_p1) target bundleno = 1135 (0x46f), region = 52 }
  0x61   : > { %s4919_s1 = sand.u32 1, %s4708_s28   ;;  %p6142_p4 = scmp.ne.s32.totalorder %s6133_s11, 0 }
  0x62   : > { %s3486_s2 = sshll.u32 %s4919_s1, 6  ;;  %s321_s15 = scalar_lea.sflag [#allocation3], %s4919_s1 }
  0x63   : > { %s4925_s18 = scalar_lea.vmem [#allocation2], %s3486_s2 }
  0x64   : > { %4687 = dma.done.wait (%p6142_p4), %s321_s15, 1024  }
  0x65   : > { %4689 = vsyncadd (%p6142_p4), %s321_s15, 4294966272  ;;  %p6143_p6 = scmp.eq.s32.totalorder %s4799_s9, 0 }
  0x67   : > { %4691 = dma.done.wait (%p6143_p6), [#allocation6], 13312   ;;  %p6144_p8 = pmov %p6143_p6 }
  0x68   : > { %p6145_p3 = pmov %p6143_p6 }
  0x69   : > { %4693 = vsyncadd (%p6144_p8), [#allocation6], 4294953984 }
  0x6a   : > { %4695 = dma.done.wait (%p6145_p3), [#allocation9], 7168   ;;  %p6146_p11 = pmov %p6145_p3 }
  0x6b   : > { %v4322_v0 = vld [vmem:[#allocation5 + $0x78] sm:$0xff]   ;;  %v4326_v4 = vld [vmem:[#allocation5 + $0x70] sm:$0xff]   ;;  %v4330_v8 = vld [vmem:[#allocation5 + $0x68] sm:$0xff]   ;;  %v380_v16 = vlaneseq  ;;  %vm6103_vm7 = vmmov 1   ;;  %s5993_s21 = scalar_lea.vmem [#allocation10], %s3486_s2  ;;  %s3830_s2 = sshll.u32 %s4799_s9, 10 }
  0x6c   : > { %4697 = vsyncadd (%p6146_p11), [#allocation9], 4294960128  ;;  %v4323_v1 = vld [vmem:[#allocation5 + $0xf8] sm:$0xff]   ;;  %3831 = vmatprep.subr.bf16.mxu0 %v4322_v0  ;;  %v4327_v5 = vld [vmem:[#allocation5 + $0xf0] sm:$0xff]   ;;  %s3373_s10 = sshll.u32 %s5993_s21, 4  ;;  %s6035_s22 = scalar_lea.hbm %s6091_s8, %s3830_s2  ;;  %s6037_s10 = int_to_ptr.vmem [resolvable:$true] %s3373_s10 }
  0x6d   : > { %v4324_v2 = vld [vmem:[#allocation5 + $0x38] sm:$0xff]   ;;  %3871 = vmatprep.subr.bf16.mxu1 %v4323_v1  ;;  %v4328_v6 = vld [vmem:[#allocation5 + $0x30] sm:$0xff]   ;;  %v4331_v9 = vld [vmem:[#allocation5 + $0xe8] sm:$0xff]   ;;  %v4939_v21 = vshrl.u32 %v380_v16, 7  ;;  %s3359_s9 = scalar_lea.sflag [#allocation4], %s4919_s1  ;;  %s4644_s15 = scalar_lea.vmem %s6037_s10, 1024 }
  0x6e   : > { %v4325_v3 = vld [vmem:[#allocation5 + $0xb8] sm:$0xff]   ;;  %3832 = vmatpush3.bf16.msra.mxu0 %v4324_v2  ;;  %v4329_v7 = vld [vmem:[#allocation5 + $0xb0] sm:$0xff]   ;;  %v4332_v10 = vld [vmem:[#allocation5 + $0x28] sm:$0xff]   ;;  %p4645_p7 = scmp.ne.s32.totalorder %s6037_s10, %s4644_s15  ;;  %p6314_p12 = scmp.ne.s32.totalorder %s6139_s26, 0 }
  0x6f   : > { %3872 = vmatpush3.bf16.msra.mxu1 %v4325_v3  ;;  %3833 = vmatprep.subr.bf16.mxu0 %v4326_v4  ;;  %v4333_v11 = vld [vmem:[#allocation5 + $0xa8] sm:$0xff]   ;;  %v4334_v12 = vld [vmem:[#allocation5 + $0x60] sm:$0xff]   ;;  %v4338_v17 = vld [vmem:[#allocation5 + $0x58] sm:$0xff]   ;;  %v393_v26 = vand.u32 15, %v4939_v21  ;;  %vm6099_vm0 = vcmp.lt.s32.totalorder %v4939_v21, 2  ;;  %v383_v28 = vadd.s32 16, %v4939_v21 }
  0x70   : > { %3873 = vmatprep.subr.bf16.mxu1 %v4327_v5  ;;  %v4335_v13 = vld [vmem:[#allocation5 + $0xe0] sm:$0xff]   ;;  %v4339_v18 = vld [vmem:[#allocation5 + $0xd8] sm:$0xff]   ;;  %v4342_v22 = vld [vmem:[#allocation5 + $0x50] sm:$0xff]   ;;  %vm6096_vm1 = vcmp.lt.s32.totalorder %v4939_v21, 3  ;;  %vm6097_vm2 = vcmp.lt.s32.totalorder %v4939_v21, 1  ;;  %v385_v31 = vadd.s32 32, %v4939_v21  ;;  %p4646_p13 = pnand %p4645_p7, %p6314_p12 }
  0x71   : > { %v4336_v14 = vld [vmem:[#allocation5 + $0x20] sm:$0xff]   ;;  %v4340_v19 = vld [vmem:[#allocation5 + $0x18] sm:$0xff]   ;;  %v4343_v23 = vld [vmem:[#allocation5 + $0xd0] sm:$0xff]   ;;  %v4948_v33 = vadd.s32 48, %v4939_v21  ;;  %v4950_v35 = vand.u32 15, %v383_v28  ;;  %v4953_v37 = vadd.s32 8, %v4939_v21 }
  0x72   : > { %3834 = vmatpush3.bf16.msra.mxu0 %v4328_v6  ;;  %v4337_v15 = vld [vmem:[#allocation5 + $0xa0] sm:$0xff]   ;;  %v4341_v20 = vld [vmem:[#allocation5 + $0x98] sm:$0xff]   ;;  %v4344_v24 = vld [vmem:[#allocation5 + $0x10] sm:$0xff]   ;;  %vm555_vm3 = vcmp.ge.s32.totalorder %v393_v26, 2  ;;  %vm502_vm4 = vcmp.ge.s32.totalorder %v393_v26, 3  ;;  %vm608_vm5 = vcmp.ge.s32.totalorder %v393_v26, 1  ;;  %p4647_p0 = pneg %p4646_p13 }
  0x73   : > { %3874 = vmatpush3.bf16.msra.mxu1 %v4329_v7  ;;  %3835 = vmatprep.subr.bf16.mxu0 %v4330_v8  ;;  %v4345_v25 = vld [vmem:[#allocation5 + $0x90] sm:$0xff]   ;;  %v4346_v27 = vld [vmem:[#allocation5 + $0x48] sm:$0xff]   ;;  %v4350_v34 = vld [vmem:[#allocation5 + $0x40] sm:$0xff]   ;;  %vm557_vm6 = vcmp.ge.s32.totalorder %v4950_v35, 2  ;;  %v4965_v43 = vand.u32 15, %v385_v31  ;;  %vm504_vm11 = vcmp.ge.s32.totalorder %v4950_v35, 3 }
  0x74   : > { %3875 = vmatprep.subr.bf16.mxu1 %v4331_v9  ;;  %v4347_v29 = vld [vmem:[#allocation5 + $0xc8] sm:$0xff]   ;;  %v4351_v36 = vld [vmem:[#allocation5 + $0xc0] sm:$0xff]   ;;  %v4962_v42 = vld [vmem:[%s4925_s18 + $0x38] sm:$0xff]  ;;  %vm610_vm12 = vcmp.ge.s32.totalorder %v4950_v35, 1  ;;  %v5073_v28 = vand.u32 15, %v4953_v37  ;;  %v5086_v37 = vadd.s32 40, %v4939_v21 }
  0x75   : > { %v4348_v30 = vld [vmem:[#allocation5 + $0x8] sm:$0xff]   ;;  %v4352_v38 = vld [vmem:[#allocation5] sm:$0xff]   ;;  %v545_v46 = vrot.slane %v4962_v42, 6  ;;  %vm4972_vm8 = vmpackc.low %vm6103_vm7, %vm555_vm3  ;;  %v492_v52 = vrot.slane %v4962_v42, 5  ;;  %v598_v58 = vrot.slane %v4962_v42, 7  ;;  %vm559_vm13 = vcmp.ge.s32.totalorder %v4965_v43, 2 }
  0x76   : > { %3836 = vmatpush3.bf16.msra.mxu0 %v4332_v10  ;;  %v4349_v32 = vld [vmem:[#allocation5 + $0x88] sm:$0xff]   ;;  %v4353_v39 = vld [vmem:[#allocation5 + $0x80] sm:$0xff]   ;;  %v4354_v49 = vld [vmem:[#allocation5 + $0x178] sm:$0xff]   ;;  %vm506_vm14 = vcmp.ge.s32.totalorder %v4965_v43, 3  ;;  %vm612_vm15 = vcmp.ge.s32.totalorder %v4965_v43, 1  ;;  %v5032_v10 = vand.u32 15, %v4948_v33 }
  0x77   : > { %3876 = vmatpush3.bf16.msra.mxu1 %v4333_v11  ;;  %3837 = vmatprep.subr.bf16.mxu0 %v4334_v12  ;;  %v4956_v40 = vld [vmem:[%s4925_s18] sm:$0xff]  ;;  %v4959_v41 = vld [vmem:[%s4925_s18 + $0x8] sm:$0xff]  ;;  %vm4983_vm9 = vmpackc.low %vm6103_vm7, %vm502_vm4  ;;  %v384_v11 = vadd.s32 24, %v4939_v21 }
  0x78   : > { %3877 = vmatprep.subr.bf16.mxu1 %v4335_v13  ;;  %v538_v44 = vrot.slane %v4956_v40, 6  ;;  %v539_v45 = vrot.slane %v4959_v41, 6  ;;  %v644_v48 = vpack.c.bf16 %v4959_v41, %v4956_v40  ;;  %v485_v50 = vrot.slane %v4956_v40, 5  ;;  %vm4998_vm10 = vmpackc.low %vm6103_vm7, %vm608_vm5  ;;  %v4355_v63 = vld [vmem:[#allocation5 + $0x1b8] sm:$0xff]   ;;  %v4357_v5 = vld [vmem:[#allocation5 + $0x170] sm:$0xff]  }
  0x79   : > { %v486_v51 = vrot.slane %v4959_v41, 5  ;;  %v591_v54 = vrot.slane %v4956_v40, 7  ;;  %v592_v57 = vrot.slane %v4959_v41, 7  ;;  %v4356_v3 = vld [vmem:[#allocation5 + $0x138] sm:$0xff]   ;;  %v4358_v6 = vld [vmem:[#allocation5 + $0x1b0] sm:$0xff]   ;;  %vm5040_vm3 = vmpackc.low %vm6103_vm7, %vm557_vm6 }
  0x7a   : > { %3838 = vmatpush3.bf16.msra.mxu0 %v4336_v14  ;;  %v553_v55 = vsel %vm6099_vm0, %v538_v44, %v539_v45  ;;  %v554_v56 = vsel %vm6099_vm0, %v545_v46, %v538_v44  ;;  %1352 = vmatprep.mubr.bf16.mxu1 %v644_v48  ;;  %v501_v62 = vsel %vm6096_vm1, %v492_v52, %v485_v50  ;;  %v4359_v7 = vld [vmem:[#allocation5 + $0x130] sm:$0xff]   ;;  %v5028_v9 = vld [vmem:[%s4925_s18 + $0x18] sm:$0xff]  ;;  %vm5051_vm4 = vmpackc.low %vm6103_vm7, %vm504_vm11 }
  0x7b   : > { %3878 = vmatpush3.bf16.msra.mxu1 %v4337_v15  ;;  %3839 = vmatprep.subr.bf16.mxu0 %v4338_v17  ;;  %v3548_v60 = vpack.c.bf16 %v553_v55, %v554_v56  ;;  %v500_v61 = vsel %vm6096_vm1, %v485_v50, %v486_v51  ;;  %v606_v1 = vsel %vm6097_vm2, %v591_v54, %v592_v57  ;;  %v5025_v8 = vld [vmem:[%s4925_s18 + $0x10] sm:$0xff]  ;;  %v541_v13 = vrot.slane %v5028_v9, 6  ;;  %v4360_v17 = vld [vmem:[#allocation5 + $0x168] sm:$0xff]   ;;  %vm5068_vm5 = vmpackc.low %vm6103_vm7, %vm610_vm12 }
  0x7c   : > { %3879 = vmatprep.subr.bf16.mxu1 %v4339_v18  ;;  %v3551_v0 = vpack.c.bf16 %v500_v61, %v501_v62  ;;  %v607_v2 = vsel %vm6097_vm2, %v598_v58, %v591_v54  ;;  %v540_v12 = vrot.slane %v5025_v8, 6  ;;  %v645_v15 = vpack.c.bf16 %v5028_v9, %v5025_v8  ;;  %v4362_v33 = vld [vmem:[#allocation5 + $0x128] sm:$0xff]   ;;  %v4365_v44 = vld [vmem:[#allocation5 + $0x120] sm:$0xff]   ;;  %vm5109_vm6 = vmpackc.low %vm6103_vm7, %vm559_vm13 }
  0x7d   : > { %3549 = vmatprep.mubr.msk.bf16.mxu0 %vm4972_vm8, %v3548_v60  ;;  %v3572_v4 = vpack.c.bf16 %v606_v1, %v607_v2  ;;  %v487_v16 = vrot.slane %v5025_v8, 5  ;;  %v488_v18 = vrot.slane %v5028_v9, 5  ;;  %vm508_vm12 = vcmp.ge.s32.totalorder %v5032_v10, 3  ;;  %v5101_v48 = vld [vmem:[%s4925_s18 + $0x20] sm:$0xff]  ;;  %vm5125_vm13 = vmpackc.low %vm6103_vm7, %vm506_vm14  ;;  %v4511_v59 = vld [vmem:[#allocation8 + $0x130] sm:$0xff]  }
  0x7e   : > { %3840 = vmatpush3.bf16.msra.mxu0 %v4340_v19  ;;  %v6155_v19 = vmov 0  ;;  %v6159_v50 = vmov 0  ;;  %v754_v54 = vrot.slane %v4956_v40, 3  ;;  %v755_v55 = vrot.slane %v4959_v41, 3  ;;  %vm5135_vm11 = vmpackc.low %vm6103_vm7, %vm612_vm15 }
  0x7f   : > { %3880 = vmatpush3.bf16.msra.mxu1 %v4341_v20  ;;  %3841 = vmatprep.subr.bf16.mxu0 %v4342_v22  ;;  %v6156_v19 = vsel %vm5051_vm4, 4294967295, %v6155_v19  ;;  %v593_v20 = vrot.slane %v5025_v8, 7  ;;  %v594_v22 = vrot.slane %v5028_v9, 7  ;;  %v499_v26 = vsel %vm6096_vm1, %v486_v51, %v487_v16 }
  0x80   : > { %3881 = vmatprep.subr.bf16.mxu1 %v4343_v23  ;;  %v4361_v23 = vld [vmem:[#allocation5 + $0x1a8] sm:$0xff]   ;;  %v6160_v50 = vsel %vm5109_vm6, 4294967295, %v6159_v50  ;;  %v702_v51 = vrot.slane %v4959_v41, 2  ;;  %v648_v56 = vrot.slane %v4956_v40, 1  ;;  %v489_v62 = vrot.slane %v5101_v48, 5 }
  0x81   : > { %v604_v31 = vsel %vm6097_vm2, %v593_v20, %v594_v22  ;;  %v595_v2 = vrot.slane %v5101_v48, 7  ;;  %vm6165_vm14 = vcmp.lt.s32.totalorder %v4939_v21, 6 }
  0x82   : > { %3842 = vmatpush3.bf16.msra.mxu0 %v4344_v24  ;;  %v551_v24 = vsel %vm6099_vm0, %v540_v12, %v541_v13 }
  0x83   : > { %3882 = vmatpush3.bf16.msra.mxu1 %v4345_v25  ;;  %3843 = vmatprep.subr.bf16.mxu0 %v4346_v27  ;;  %v552_v25 = vsel %vm6099_vm0, %v539_v45, %v540_v12  ;;  %v701_v45 = vrot.slane %v4956_v40, 2  ;;  %v4392_v40 = vld [vmem:[#allocation7 + $0xf4] ss:$24 sps:$4 sm:$0xff]   ;;  %v4517_v27 = vld [vmem:[#allocation8 + $0x120] sm:$0xff]  }
  0x84   : > { %3883 = vmatprep.subr.bf16.mxu1 %v4347_v29  ;;  %v3554_v29 = vpack.c.bf16 %v551_v24, %v552_v25  ;;  %v649_v24 = vrot.slane %v4959_v41, 1  ;;  %v4371_v25 = vld [vmem:[#allocation5 + $0x110] sm:$0xff]   ;;  %v6184_v41 = vmov 0 }
  0x86   : > { %3844 = vmatpush3.bf16.msra.mxu0 %v4348_v30  ;;  %v498_v30 = vsel %vm6096_vm1, %v487_v16, %v488_v18  ;;  %v603_v16 = vsel %vm6097_vm2, %v594_v22, %v595_v2  ;;  %v4370_v22 = vld [vmem:[#allocation5 + $0x190] sm:$0xff]  }
  0x87   : > { %3884 = vmatpush3.bf16.msra.mxu1 %v4349_v32  ;;  %3845 = vmatprep.subr.bf16.mxu0 %v4350_v34  ;;  %v605_v32 = vsel %vm6097_vm2, %v592_v57, %v593_v20  ;;  %v3557_v34 = vpack.c.bf16 %v498_v30, %v499_v26  ;;  %v542_v57 = vrot.slane %v5101_v48, 6  ;;  %v4369_v20 = vld [vmem:[#allocation5 + $0x150] sm:$0xff]   ;;  %v756_v30 = vrot.slane %v5025_v8, 3 }
  0x88   : > { %3885 = vmatprep.subr.bf16.mxu1 %v4351_v36  ;;  %v3575_v35 = vpack.c.bf16 %v604_v31, %v605_v32  ;;  %v4363_v36 = vld [vmem:[#allocation5 + $0x160] sm:$0xff]   ;;  %v5165_v26 = vld [vmem:[%s4925_s18 + $0x30] sm:$0xff]  ;;  %v757_v31 = vrot.slane %v5028_v9, 3 }
  0x89   : > { %v544_v32 = vrot.slane %v5165_v26, 6 }
  0x8a   : > { %3846 = vmatpush3.bf16.msra.mxu0 %v4352_v38  ;;  %v4364_v38 = vld [vmem:[#allocation5 + $0x1a0] sm:$0xff]  }
  0x8b   : > { %3886 = vmatpush3.bf16.msra.mxu1 %v4353_v39  ;;  %3911 = vmatprep.subr.bf16.mxu0 %v4354_v49  ;;  %v5092_v39 = vand.u32 15, %v384_v11  ;;  %v5104_v49 = vld [vmem:[%s4925_s18 + $0x28] sm:$0xff]  ;;  %v497_v11 = vsel %vm6096_vm1, %v488_v18, %v489_v62 }
  0x8c   : > { %4147 = vmatprep.subr.bf16.mxu1 %v4355_v63  ;;  %v543_v60 = vrot.slane %v5104_v49, 6  ;;  %v646_v61 = vpack.c.bf16 %v5104_v49, %v5101_v48  ;;  %v490_v1 = vrot.slane %v5104_v49, 5 }
  0x8d   : > { %3552 = vmatmul.mubr.msk.bf16.vlgmr.msra.gmra.mxu0 %vm4983_vm9, %v3551_v0  ;;  %v4366_v0 = vld [vmem:[#allocation5 + $0x158] sm:$0xff]  }
  0x8e   : > { %3573 = vmatmul.mubr.msk.bf16.vlgmr.msra.gmra.mxu1 %vm4998_vm10, %v3572_v4  ;;  %3912 = vmatpush3.bf16.msra.mxu0 %v4356_v3  ;;  %v596_v3 = vrot.slane %v5104_v49, 7  ;;  %v6163_v4 = vmov 0  ;;  %v496_v12 = vsel %vm6096_vm1, %v489_v62, %v490_v1  ;;  %vm6166_vm1 = vcmp.ge.s32.totalorder %v5032_v10, 2 }
  0x8f   : > { %4148 = vmatpush3.bf16.msra.mxu1 %v4355_v63  ;;  %3913 = vmatprep.subr.bf16.mxu0 %v4357_v5  ;;  %v6161_v63 = vmov 0  ;;  %v6164_v4 = vsel %vm5135_vm11, 4294967295, %v6163_v4  ;;  %v4367_v5 = vld [vmem:[#allocation5 + $0x198] sm:$0xff]   ;;  %vm5181_vm15 = vmpackc.low %vm6103_vm7, %vm6166_vm1  ;;  %vm6172_vm1 = vcmp.lt.s32.totalorder %v4939_v21, 6  ;;  %v650_v62 = vrot.slane %v5025_v8, 1 }
  0x90   : > { %4149 = vmatprep.subr.bf16.mxu1 %v4358_v6  ;;  %1360 = vmatprep.mubr.bf16.mxu1 %v645_v15  ;;  %v6162_v63 = vsel %vm5125_vm13, 4294967295, %v6161_v63  ;;  %v602_v15 = vsel %vm6097_vm2, %v595_v2, %v596_v3  ;;  %vm6173_vm2 = vcmp.lt.s32.totalorder %v4939_v21, 5  ;;  %v547_v2 = vsel %vm6099_vm0, %v544_v32, %v545_v46 }
  0x91   : > { %3555 = vmatprep.mubr.msk.bf16.mxu0 %vm5040_vm3, %v3554_v29  ;;  %v3578_v18 = vpack.c.bf16 %v602_v15, %v603_v16  ;;  %v5171_v29 = vsel %vm6165_vm14, %v701_v45, %v702_v51  ;;  %vm5192_vm14 = vmpackc.low %vm6103_vm7, %vm508_vm12  ;;  %vm6174_vm12 = vcmp.lt.s32.totalorder %v4939_v21, 3  ;;  %v4375_v16 = vld [vmem:[#allocation5 + $0x140] sm:$0xff]  }
  0x92   : > { %3914 = vmatpush3.bf16.msra.mxu0 %v4359_v7  ;;  %v550_v7 = vsel %vm6099_vm0, %v541_v13, %v542_v57  ;;  %v3563_v13 = vpack.c.bf16 %v496_v12, %v497_v11  ;;  %v758_v11 = vrot.slane %v5101_v48, 3 }
  0x93   : > { %4150 = vmatpush3.bf16.msra.mxu1 %v4358_v6  ;;  %3915 = vmatprep.subr.bf16.mxu0 %v4360_v17  ;;  %v549_v6 = vsel %vm6099_vm0, %v542_v57, %v543_v60  ;;  %v4368_v17 = vld [vmem:[#allocation5 + $0x118] sm:$0xff]  }
  0x94   : > { %4151 = vmatprep.subr.bf16.mxu1 %v4361_v23  ;;  %v3560_v43 = vpack.c.bf16 %v549_v6, %v550_v7  ;;  %v6176_v6 = vmov 0  ;;  %v4373_v7 = vld [vmem:[#allocation5 + $0x188] sm:$0xff]  }
  0x95   : > { %3558 = vmatmul.mubr.msk.bf16.gmra.mxu0 %vm5051_vm4, %v3557_v34  ;;  %v647_v34 = vpack.c.bf16 %v4962_v42, %v5165_v26 }
  0x96   : > { %3576 = vmatmul.mubr.msk.bf16.gmra.mxu1 %vm5068_vm5, %v3575_v35  ;;  %3916 = vmatpush3.bf16.msra.mxu0 %v4362_v33  ;;  %v6167_v33 = vmov 0  ;;  %v491_v35 = vrot.slane %v5165_v26, 5 }
  0x97   : > { %4152 = vmatpush3.bf16.msra.mxu1 %v4361_v23  ;;  %3917 = vmatprep.subr.bf16.mxu0 %v4363_v36  ;;  %v703_v23 = vrot.slane %v5025_v8, 2  ;;  %v6168_v33 = vsel %vm5181_vm15, 4294967295, %v6167_v33  ;;  %v597_v36 = vrot.slane %v5165_v26, 7 }
  0x98   : > { %4153 = vmatprep.subr.bf16.mxu1 %v4364_v38  ;;  %1368 = vmatprep.mubr.bf16.mxu1 %v646_v61  ;;  %v769_v61 = vsel %vm6173_vm2, %v754_v54, %v755_v55  ;;  %vm6175_vm2 = vcmp.ge.s32.totalorder %v5032_v10, 1  ;;  %v4374_v10 = vld [vmem:[#allocation5 + $0x108] sm:$0xff]  }
  0x99   : > { %3561 = vmatprep.mubr.msk.bf16.mxu0 %vm5109_vm6, %v3560_v43  ;;  %v715_v57 = vsel %vm6172_vm1, %v702_v51, %v703_v23  ;;  %v548_v51 = vsel %vm6099_vm0, %v543_v60, %v544_v32  ;;  %vm5221_vm1 = vmpackc.low %vm6103_vm7, %vm6175_vm2  ;;  %vm6180_vm0 = vcmp.lt.s32.totalorder %v4939_v21, 1  ;;  %vm6182_vm2 = vcmp.lt.s32.totalorder %v4939_v21, 5 }
  0x9a   : > { %3918 = vmatpush3.bf16.msra.mxu0 %v4365_v44  ;;  %v6169_v44 = vmov 0  ;;  %v6177_v6 = vsel %vm5221_vm1, 4294967295, %v6176_v6  ;;  %v3566_v46 = vpack.c.bf16 %v547_v2, %v548_v51  ;;  %v600_v43 = vsel %vm6180_vm0, %v597_v36, %v598_v58  ;;  %v4376_v58 = vld [vmem:[#allocation5 + $0x180] sm:$0xff]  }
  0x9b   : > { %4154 = vmatpush3.bf16.msra.mxu1 %v4364_v38  ;;  %3919 = vmatprep.subr.bf16.mxu0 %v4366_v0  ;;  %v4372_v38 = vld [vmem:[#allocation5 + $0x148] sm:$0xff]   ;;  %v6170_v44 = vsel %vm5192_vm14, 4294967295, %v6169_v44  ;;  %v704_v0 = vrot.slane %v5028_v9, 2  ;;  %6178 = vst [vmem:[#allocation16_spill] sm:$0xff] %v6177_v6  ;;  %v6189_v32 = vmov 0  ;;  %v651_v2 = vrot.slane %v5028_v9, 1 }
  0x9c   : > { %4155 = vmatprep.subr.bf16.mxu1 %v4367_v5  ;;  %6171 = vst [vmem:[#allocation15_spill] sm:$0xff] %v6170_v44  ;;  %v652_v51 = vrot.slane %v5101_v48, 1  ;;  %v6209_v9 = vmov 0  ;;  %vm6214_vm6 = vcmp.lt.s32.totalorder %v5092_v39, 15 }
  0x9d   : > { %3564 = vmatmul.mubr.msk.bf16.gmra.mxu0 %vm5125_vm13, %v3563_v13  ;;  %vm6179_vm13 = vmmov %vm6174_vm12  ;;  %v759_v13 = vrot.slane %v5104_v49, 3 }
  0x9e   : > { %3579 = vmatmul.mubr.msk.bf16.gmra.mxu1 %vm5135_vm11, %v3578_v18  ;;  %3920 = vmatpush3.bf16.msra.mxu0 %v4368_v17  ;;  %v495_v60 = vsel %vm6179_vm13, %v490_v1, %v491_v35  ;;  %v768_v17 = vsel %vm6182_vm2, %v755_v55, %v756_v30  ;;  %v705_v1 = vrot.slane %v5101_v48, 2  ;;  %v3584_v18 = vpack.c.bf16 %v715_v57, %v5171_v29 }
  0x9f   : > { %4156 = vmatpush3.bf16.msra.mxu1 %v4367_v5  ;;  %3921 = vmatprep.subr.bf16.mxu0 %v4369_v20  ;;  %v494_v5 = vsel %vm6174_vm12, %v491_v35, %v492_v52  ;;  %vm6181_vm12 = vmmov %vm6180_vm0  ;;  %v760_v20 = vrot.slane %v5165_v26, 3  ;;  %vm6183_vm0 = vcmp.lt.s32.totalorder %v5073_v28, 14  ;;  %v3608_v55 = vpack.c.bf16 %v768_v17, %v769_v61 }
  0xa0   : > { %4157 = vmatprep.subr.bf16.mxu1 %v4370_v22  ;;  %1376 = vmatprep.mubr.bf16.mxu1 %v647_v34  ;;  %v601_v52 = vsel %vm6181_vm12, %v596_v3, %v597_v36  ;;  %v3569_v12 = vpack.c.bf16 %v494_v5, %v495_v60  ;;  %v4377_v3 = vld [vmem:[#allocation5 + $0x100] sm:$0xff]   ;;  %vm5249_vm13 = vmpackc.low %vm6183_vm0, %vm6103_vm7  ;;  %vm6192_vm0 = vcmp.lt.s32.totalorder %v4939_v21, 7  ;;  %v6202_v57 = vmov 0 }
  0xa1   : > { %v3581_v15 = vpack.c.bf16 %v600_v43, %v601_v52  ;;  %3567 = vmatprep.mubr.msk.bf16.mxu0 %vm5181_vm15, %v3566_v46  ;;  %v6185_v41 = vsel %vm5249_vm13, 4294967295, %v6184_v41  ;;  %vm6187_vm12 = vmmov %vm6182_vm2  ;;  %vm6188_vm2 = vcmp.lt.s32.totalorder %v5073_v28, 13  ;;  %vm666_vm15 = vcmp.lt.s32.totalorder %v5073_v28, 15 }
  0xa2   : > { %3922 = vmatpush3.bf16.msra.mxu0 %v4371_v25  ;;  %6186 = vst [vmem:[#allocation17_spill] sm:$0xff] %v6185_v41  ;;  %v388_v25 = vadd.s32 56, %v4939_v21  ;;  %v767_v29 = vsel %vm6187_vm12, %v756_v30, %v757_v31  ;;  %v766_v30 = vsel %vm6187_vm12, %v757_v31, %v758_v11  ;;  %v764_v28 = vsel %vm6187_vm12, %v759_v13, %v760_v20 }
  0xa3   : > { %4158 = vmatpush3.bf16.msra.mxu1 %v4370_v22  ;;  %3923 = vmatprep.subr.bf16.mxu0 %v4372_v38  ;;  %v428_v22 = vand.u32 15, %v5086_v37  ;;  %v662_v37 = vsel %vm6192_vm0, %v649_v24, %v650_v62  ;;  %v6198_v31 = vmov 0  ;;  %v3611_v61 = vpack.c.bf16 %v766_v30, %v767_v29  ;;  %v4380_v30 = vld [vmem:[#allocation7 + $0x154] ss:$24 sps:$4 sm:$0xff]  }
  0xa4   : > { %4159 = vmatprep.subr.bf16.mxu1 %v4373_v7  ;;  %v442_v38 = vand.u32 15, %v388_v25  ;;  %v6206_v5 = vmov 0  ;;  %v707_v46 = vrot.slane %v5165_v26, 2  ;;  %v761_v60 = vrot.slane %v4962_v42, 3 }
  0xa5   : > { %3570 = vmatmul.mubr.msk.bf16.gmra.mxu0 %vm5192_vm14, %v3569_v12  ;;  %vm5262_vm14 = vmpackc.low %vm6188_vm2, %vm6103_vm7  ;;  %vm6194_vm7 = vcmp.lt.s32.totalorder %v4939_v21, 6 }
  0xa6   : > { %3582 = vmatmul.mubr.msk.bf16.gmra.mxu1 %vm5221_vm1, %v3581_v15  ;;  %3924 = vmatpush3.bf16.msra.mxu0 %v4374_v10  ;;  %v6190_v32 = vsel %vm5262_vm14, 4294967295, %v6189_v32  ;;  %vm6193_vm1 = vmmov %vm6192_vm0  ;;  %v713_v35 = vsel %vm6194_vm7, %v704_v0, %v705_v1  ;;  %v6215_v10 = vmov 0 }
  0xa7   : > { %6191 = vst [vmem:[#allocation18_spill] sm:$0xff] %v6190_v32  ;;  %v663_v34 = vsel %vm6193_vm1, %v648_v56, %v649_v24  ;;  %4160 = vmatpush3.bf16.msra.mxu1 %v4373_v7  ;;  %3925 = vmatprep.subr.bf16.mxu0 %v4375_v16  ;;  %vm6195_vm0 = vmmov %vm6194_vm7  ;;  %vm6197_vm7 = vmmov 1   ;;  %v6225_v16 = vmov 0 }
  0xa8   : > { %v714_v36 = vsel %vm6195_vm0, %v703_v23, %v704_v0  ;;  %4161 = vmatprep.subr.bf16.mxu1 %v4376_v58  ;;  %3585 = vmatprep.mubr.msk.bf16.mxu0 %vm5249_vm13, %v3584_v18  ;;  %vm6196_vm2 = vmmov %vm6187_vm12  ;;  %v3587_v23 = vpack.c.bf16 %v662_v37, %v663_v34  ;;  %vm776_vm13 = vcmp.lt.s32.totalorder %v428_v22, 13  ;;  %vm6201_vm12 = vcmp.lt.s32.totalorder %v5092_v39, 13 }
  0xa9   : > { %v765_v24 = vsel %vm6196_vm2, %v758_v11, %v759_v13  ;;  %4163 = vmatprep.mubr.msk.bf16.mxu1 %vm5262_vm14, %v3608_v55  ;;  %vm5296_vm11 = vmpackc.low %vm666_vm15, %vm6197_vm7  ;;  %v3590_v0 = vpack.c.bf16 %v713_v35, %v714_v36  ;;  %vm6205_vm15 = vcmp.lt.s32.totalorder %v5092_v39, 14  ;;  %v706_v11 = vrot.slane %v5104_v49, 2  ;;  %v4383_v35 = vld [vmem:[#allocation7 + $0x15c] ss:$24 sps:$4 sm:$0xff]   ;;  %v4378_v36 = vld [vmem:[#allocation7 + $0x150] ss:$24 sps:$4 sm:$0xff]  }
  0xaa   : > { %v6199_v31 = vsel %vm5296_vm11, 4294967295, %v6198_v31  ;;  %3926 = vmatpush3.bf16.msra.mxu0 %v4377_v3  ;;  %vm5304_vm1 = vmpackc.low %vm6201_vm12, %vm6197_vm7  ;;  %v3614_v7 = vpack.c.bf16 %v764_v28, %v765_v24  ;;  %vm723_vm0 = vcmp.lt.s32.totalorder %v428_v22, 14  ;;  %vm6212_vm14 = vcmp.lt.s32.totalorder %v4939_v21, 7  ;;  %v4381_v28 = vld [vmem:[#allocation7 + $0x158] ss:$24 sps:$4 sm:$0xff]  }
  0xab   : > { %6200 = vst [vmem:[#allocation19_spill] sm:$0xff] %v6199_v31  ;;  %v6203_v57 = vsel %vm5304_vm1, 4294967295, %v6202_v57  ;;  %4162 = vmatpush3.bf16.msra.mxu1 %v4376_v58  ;;  %vm5313_vm2 = vmpackc.low %vm6205_vm15, %vm6197_vm7  ;;  %vm778_vm15 = vcmp.lt.s32.totalorder %v442_v38, 13  ;;  %v660_v43 = vsel %vm6212_vm14, %v651_v2, %v652_v51  ;;  %v653_v58 = vrot.slane %v5104_v49, 1  ;;  %1839 = vmatprep.subr.bf16.mxu0 %v4380_v30  ;;  %v4386_v24 = vld [vmem:[#allocation7 + $0x124] ss:$24 sps:$4 sm:$0xff]  }
  0xac   : > { %6204 = vst [vmem:[#allocation20_spill] sm:$0xff] %v6203_v57  ;;  %v6207_v5 = vsel %vm5313_vm2, 4294967295, %v6206_v5  ;;  %vm5321_vm12 = vmpackc.low %vm776_vm13, %vm6197_vm7  ;;  %v654_v13 = vrot.slane %v5165_v26, 1  ;;  %v6228_v3 = vmov 0  ;;  %v6231_v18 = vmov 0  ;;  %1912 = vmatprep.subr.bf16.mxu1 %v4383_v35 }
  0xad   : > { %6208 = vst [vmem:[#allocation21_spill] sm:$0xff] %v6207_v5  ;;  %v6210_v9 = vsel %vm5321_vm12, 4294967295, %v6209_v9  ;;  %3588 = vmatmul.mubr.msk.bf16.vlgmr.msra.gmra.mxu0 %vm5296_vm11, %v3587_v23  ;;  %vm6213_vm13 = vmmov %vm6212_vm14  ;;  %vm670_vm11 = vcmp.lt.s32.totalorder %v428_v22, 15  ;;  %v655_v22 = vrot.slane %v4962_v42, 1  ;;  %v6238_v37 = vmov 0 }
  0xae   : > { %6211 = vst [vmem:[#allocation22_spill] sm:$0xff] %v6210_v9  ;;  %4164 = vmatmul.mubr.msk.bf16.vlgmr.msra.gmra.mxu1 %vm5304_vm1, %v3611_v61  ;;  %3591 = vmatprep.mubr.msk.bf16.mxu0 %vm5313_vm2, %v3590_v0  ;;  %v661_v52 = vsel %vm6213_vm13, %v650_v62, %v651_v2  ;;  %vm5340_vm4 = vmpackc.low %vm6214_vm6, %vm6197_vm7  ;;  %vm6218_vm2 = vcmp.lt.s32.totalorder %v4939_v21, 6  ;;  %v6220_v62 = vmov 0  ;;  %vm6223_vm6 = vcmp.lt.s32.totalorder %v4939_v21, 5  ;;  %v4389_v23 = vld [vmem:[#allocation7 + $0x12c] ss:$24 sps:$4 sm:$0xff]  }
  0xaf   : > { %v6216_v10 = vsel %vm5340_vm4, 4294967295, %v6215_v10  ;;  %4167 = vmatprep.mubr.msk.bf16.mxu1 %vm5321_vm12, %v3614_v7  ;;  %v711_v12 = vsel %vm6218_vm2, %v706_v11, %v707_v46  ;;  %vm6219_vm14 = vmmov %vm6218_vm2  ;;  %v763_v39 = vsel %vm6223_vm6, %v760_v20, %v761_v60  ;;  %vm725_vm1 = vcmp.lt.s32.totalorder %v442_v38, 14  ;;  %1840 = vmatpush1.bf16.msra.mxu0 %v4378_v36  ;;  %v4387_v61 = vld [vmem:[#allocation7 + $0x128] ss:$24 sps:$4 sm:$0xff]   ;;  %v4393_v2 = vld [vmem:[#allocation7 + $0xf8] ss:$24 sps:$4 sm:$0xff]  }
  0xb0   : > { %6217 = vst [vmem:[#allocation23_spill] sm:$0xff] %v6216_v10  ;;  %v712_v8 = vsel %vm6219_vm14, %v705_v1, %v706_v11  ;;  %vm5353_vm13 = vmpackc.low %vm723_vm0, %vm6197_vm7  ;;  %v3593_v48 = vpack.c.bf16 %v660_v43, %v661_v52  ;;  %1913 = vmatpush1.bf16.msra.mxu1 %v4381_v28  ;;  %1841 = vmatprep.subr.bf16.mxu0 %v4386_v24  ;;  %v4390_v0 = vld [vmem:[#allocation7 + $0xf0] ss:$24 sps:$4 sm:$0xff]   ;;  %v4401_v7 = vld [vmem:[#allocation7 + $0xcc] ss:$24 sps:$4 sm:$0xff]  }
  0xb1   : > { %v6221_v62 = vsel %vm5353_vm13, 4294967295, %v6220_v62  ;;  %vm6224_vm12 = vmmov %vm6223_vm6  ;;  %v3596_v17 = vpack.c.bf16 %v711_v12, %v712_v8  ;;  %vm672_vm6 = vcmp.lt.s32.totalorder %v442_v38, 15  ;;  %v4384_v38 = vld [vmem:[#allocation7 + $0x120] ss:$24 sps:$4 sm:$0xff]   ;;  %1914 = vmatprep.subr.bf16.mxu1 %v4389_v23  ;;  %v4407_v43 = vld [vmem:[#allocation7 + $0x9c] ss:$24 sps:$4 sm:$0xff]  }
  0xb2   : > { %6222 = vst [vmem:[#allocation24_spill] sm:$0xff] %v6221_v62  ;;  %v770_v15 = vsel %vm6224_vm12, %v761_v60, %v754_v54  ;;  %vm5364_vm2 = vmpackc.low %vm778_vm15, %vm6197_vm7  ;;  %v708_v54 = vrot.slane %v4962_v42, 2  ;;  %v4396_v11 = vld [vmem:[#allocation7 + $0xc0] ss:$24 sps:$4 sm:$0xff]   ;;  %v4404_v60 = vld [vmem:[#allocation7 + $0x94] ss:$24 sps:$4 sm:$0xff]  }
  0xb3   : > { %v6226_v16 = vsel %vm5364_vm2, 4294967295, %v6225_v16  ;;  %v3617_v1 = vpack.c.bf16 %v770_v15, %v763_v39  ;;  %vm5371_vm0 = vmpackc.low %vm670_vm11, %vm6197_vm7  ;;  %vm6234_vm11 = vcmp.lt.s32.totalorder %v4939_v21, 7  ;;  %1842 = vmatpush1.bf16.msra.mxu0 %v4384_v38  ;;  %v4402_v52 = vld [vmem:[#allocation7 + $0x90] ss:$24 sps:$4 sm:$0xff]   ;;  %v4410_v8 = vld [vmem:[#allocation7 + $0x64] ss:$24 sps:$4 sm:$0xff]  }
  0xb4   : > { %6227 = vst [vmem:[#allocation25_spill] sm:$0xff] %v6226_v16  ;;  %v6229_v3 = vsel %vm5371_vm0, 4294967295, %v6228_v3  ;;  %vm5377_vm12 = vmpackc.low %vm725_vm1, %vm6197_vm7  ;;  %v658_v49 = vsel %vm6234_vm11, %v653_v58, %v654_v13  ;;  %v657_v34 = vsel %vm6234_vm11, %v654_v13, %v655_v22  ;;  %1915 = vmatpush1.bf16.msra.mxu1 %v4387_v61  ;;  %1843 = vmatprep.subr.bf16.mxu0 %v4392_v40  ;;  %v4405_v12 = vld [vmem:[#allocation7 + $0x98] ss:$24 sps:$4 sm:$0xff]   ;;  %v4413_v39 = vld [vmem:[#allocation7 + $0x6c] ss:$24 sps:$4 sm:$0xff]  }
  0xb5   : > { %6230 = vst [vmem:[#allocation26_spill] sm:$0xff] %v6229_v3  ;;  %v6232_v18 = vsel %vm5377_vm12, 4294967295, %v6231_v18  ;;  %3594 = vmatmul.mubr.msk.bf16.gmra.mxu0 %vm5340_vm4, %v3593_v48  ;;  %vm6235_vm15 = vmmov %vm6234_vm11  ;;  %v4408_v15 = vld [vmem:[#allocation7 + $0x60] ss:$24 sps:$4 sm:$0xff]  }
  0xb6   : > { %6233 = vst [vmem:[#allocation27_spill] sm:$0xff] %v6232_v18  ;;  %3597 = vmatprep.mubr.msk.bf16.mxu0 %vm5353_vm13, %v3596_v17  ;;  %4168 = vmatmul.mubr.msk.bf16.gmra.mxu1 %vm5364_vm2, %v3617_v1  ;;  %v659_v26 = vsel %vm6235_vm15, %v652_v51, %v653_v58  ;;  %vm6236_vm1 = vmmov %vm6219_vm14  ;;  %v4398_v51 = vld [vmem:[#allocation7 + $0xc4] ss:$24 sps:$4 sm:$0xff]   ;;  %v4411_v48 = vld [vmem:[#allocation7 + $0x68] ss:$24 sps:$4 sm:$0xff]  }
  0xb7   : > { %v710_v20 = vsel %vm6236_vm1, %v707_v46, %v708_v54  ;;  %vm6237_vm14 = vmmov %vm6236_vm1  ;;  %v3599_v25 = vpack.c.bf16 %v658_v49, %v659_v26  ;;  %1844 = vmatpush1.bf16.msra.mxu0 %v4390_v0  ;;  %v4399_v46 = vld [vmem:[#allocation7 + $0xc8] ss:$24 sps:$4 sm:$0xff]   ;;  %v4416_v17 = vld [vmem:[#allocation7 + $0x34] ss:$24 sps:$4 sm:$0xff]   ;;  %vm6244_vm1 = vcmp.lt.s32.totalorder %v4939_v21, 1 }
  0xb8   : > { %v717_v55 = vsel %vm6237_vm14, %v708_v54, %v701_v45  ;;  %vm5399_vm2 = vmpackc.low %vm672_vm6, %vm6197_vm7  ;;  %1845 = vmatprep.subr.bf16.mxu0 %v4398_v51  ;;  %v4419_v1 = vld [vmem:[#allocation7 + $0x3c] ss:$24 sps:$4 sm:$0xff]   ;;  %v4414_v58 = vld [vmem:[#allocation7 + $0x30] ss:$24 sps:$4 sm:$0xff]   ;;  %vm6243_vm7 = vcmp.lt.s32.totalorder %v4939_v21, 2  ;;  %vm6245_vm14 = vcmp.lt.s32.totalorder %v4939_v21, 3 }
  0xb9   : > { %v3602_v29 = vpack.c.bf16 %v717_v55, %v710_v20  ;;  %v6239_v37 = vsel %vm5399_vm2, 4294967295, %v6238_v37  ;;  %vm6241_vm15 = vmmov %vm6234_vm11  ;;  %v4417_v13 = vld [vmem:[#allocation7 + $0x38] ss:$24 sps:$4 sm:$0xff]   ;;  %v4422_v54 = vld [vmem:[#allocation7 + $0x4] ss:$24 sps:$4 sm:$0xff]  }
  0xba   : > { %6240 = vst [vmem:[#allocation28_spill] sm:$0xff] %v6239_v37  ;;  %v664_v42 = vsel %vm6241_vm15, %v655_v22, %v648_v56  ;;  %v4395_v56 = vld [vmem:[#allocation7 + $0xfc] ss:$24 sps:$4 sm:$0xff]   ;;  %v4425_v49 = vld [vmem:[#allocation7 + $0xc] ss:$24 sps:$4 sm:$0xff]   ;;  %v6115_v22 = vmov 0   ;;  %vm6246_vm6 = vmmov %vm6243_vm7 }
  0xbb   : > { %v3605_v45 = vpack.c.bf16 %v664_v42, %v657_v34  ;;  %1916 = vmatprep.subr.bf16.mxu1 %v4395_v56  ;;  %1846 = vmatpush1.bf16.msra.mxu0 %v4396_v11  ;;  %v4420_v26 = vld [vmem:[#allocation7] ss:$24 sps:$4 sm:$0xff]   ;;  %v4428_v55 = vld [vmem:[#allocation7 + $0x164] ss:$24 sps:$4 sm:$0xff]   ;;  %vm6247_vm11 = vmmov %vm6246_vm6 }
  0xbc   : > { %1917 = vmatpush1.bf16.msra.mxu1 %v4393_v2  ;;  %1847 = vmatprep.subr.bf16.mxu0 %v4404_v60  ;;  %v4423_v20 = vld [vmem:[#allocation7 + $0x8] ss:$24 sps:$4 sm:$0xff]   ;;  %vm6248_vm15 = vmmov %vm6246_vm6 }
  0xbd   : > { %3600 = vmatmul.mubr.msk.bf16.gmra.mxu0 %vm5371_vm0, %v3599_v25  ;;  %1918 = vmatprep.subr.bf16.mxu1 %v4401_v7 }
  0xbe   : > { %3603 = vmatprep.mubr.msk.bf16.mxu0 %vm5377_vm12, %v3602_v29  ;;  %1944 = vmatprep.mubr.bf16.mxu1 %v6115_v22 }
  0xbf   : > { %1848 = vmatpush1.bf16.msra.mxu0 %v4402_v52 }
  0xc0   : > { %1919 = vmatpush1.bf16.msra.mxu1 %v4399_v46  ;;  %1849 = vmatprep.subr.bf16.mxu0 %v4410_v8 }
  0xc1   : > { %1920 = vmatprep.subr.bf16.mxu1 %v4407_v43 }
  0xc3   : > { %1850 = vmatpush1.bf16.msra.mxu0 %v4408_v15 }
  0xc4   : > { %1921 = vmatpush1.bf16.msra.mxu1 %v4405_v12  ;;  %1851 = vmatprep.subr.bf16.mxu0 %v4416_v17 }
  0xc5   : > { %3606 = vmatmul.mubr.msk.bf16.gmra.mxu0 %vm5399_vm2, %v3605_v45  ;;  %1922 = vmatprep.subr.bf16.mxu1 %v4413_v39 }
  0xc6   : > { %1871 = vmatprep.mubr.bf16.mxu0 %v6115_v22 }
  0xc7   : > { %1852 = vmatpush1.bf16.msra.mxu0 %v4414_v58 }
  0xc8   : > { %1923 = vmatpush1.bf16.msra.mxu1 %v4411_v48  ;;  %1853 = vmatprep.subr.bf16.mxu0 %v4422_v54 }
  0xc9   : > { %1924 = vmatprep.subr.bf16.mxu1 %v4419_v1 }
  0xcb   : > { %1854 = vmatpush1.bf16.msra.mxu0 %v4420_v26 }
  0xcc   : > { %1925 = vmatpush1.bf16.msra.mxu1 %v4417_v13  ;;  %1985 = vmatprep.subr.bf16.mxu0 %v4428_v55 }
  0xcd   : > { %1926 = vmatprep.subr.bf16.mxu1 %v4425_v49 }
  0xd0   : > { %1927 = vmatpush1.bf16.msra.mxu1 %v4423_v20 }
 0x14d   : > { %v3847_v25 = vpop.f32.mrf.mxu0 }
 0x14e   : > { %v3887_v29 = vpop.f32.mrf.mxu1 }
 0x14f   : > { %v3848_v34 = vpop.f32.mrf.mxu0 }
 0x150   : > { %v3888_v42 = vpop.f32.mrf.mxu1  ;;  %v3849_v54 = vadd.f32 %v3848_v34, %v3847_v25 }
 0x151   : > { %v3850_v45 = vpop.f32.mrf.mxu0  ;;  %v3889_v49 = vadd.f32 %v3888_v42, %v3887_v29 }
 0x152   : > { %v3890_v30 = vpop.f32.mrf.mxu1 }
 0x153   : > { %v3851_v35 = vpop.f32.mrf.mxu0  ;;  %v1355_v18 = vadd.f32 %v3889_v49, %v3849_v54  ;;  %v4431_v49 = vld [vmem:[#allocation7 + $0x134] ss:$24 sps:$4 sm:$0xff]  }
 0x154   : > { %v3891_v36 = vpop.f32.mrf.mxu1  ;;  %v3852_v55 = vadd.f32 %v3851_v35, %v3850_v45 }
 0x155   : > { %v3853_v28 = vpop.f32.mrf.mxu0  ;;  %v3892_v22 = vadd.f32 %v3891_v36, %v3890_v30  ;;  %v4426_v36 = vld [vmem:[#allocation7 + $0x160] ss:$24 sps:$4 sm:$0xff]  }
 0x156   : > { %v3893_v24 = vpop.f32.mrf.mxu1 }
 0x157   : > { %v3854_v23 = vpop.f32.mrf.mxu0  ;;  %v1358_v10 = vadd.f32 %v3892_v22, %v3852_v55 }
 0x158   : > { %v3894_v38 = vpop.f32.mrf.mxu1  ;;  %v3855_v41 = vadd.f32 %v3854_v23, %v3853_v28 }
 0x159   : > { %v3856_v61 = vpop.f32.mrf.mxu0  ;;  %v3895_v32 = vadd.f32 %v3894_v38, %v3893_v24 }
 0x15a   : > { %v3896_v40 = vpop.f32.mrf.mxu1 }
 0x15b   : > { %v3857_v56 = vpop.f32.mrf.mxu0 }
 0x15c   : > { %v3897_v0 = vpop.f32.mrf.mxu1  ;;  %v3858_v6 = vadd.f32 %v3857_v56, %v3856_v61  ;;  %v4432_v56 = vld [vmem:[#allocation7 + $0x100] ss:$24 sps:$4 sm:$0xff]  }
 0x15d   : > { %v3859_v2 = vpop.f32.mrf.mxu0  ;;  %v3898_v34 = vadd.f32 %v3897_v0, %v3896_v40 }
 0x15e   : > { %v3899_v51 = vpop.f32.mrf.mxu1 }
 0x15f   : > { %v3860_v7 = vpop.f32.mrf.mxu0 }
 0x160   : > { %v3900_v11 = vpop.f32.mrf.mxu1 }
 0x161   : > { %v3862_v46 = vpop.f32.mrf.mxu0 }
 0x162   : > { %v5417_v60 = vpop.f32.mrf.mxu1 }
 0x163   : > { %v3863_v43 = vpop.f32.mrf.mxu0 }
 0x164   : > { %v3903_v52 = vpop.f32.mrf.mxu1 }
 0x165   : > { %v5419_v12 = vpop.f32.mrf.mxu0  ;;  %v3904_v24 = vadd.f32 %v3903_v52, %v5417_v60  ;;  %v4435_v60 = vld [vmem:[#allocation7 + $0xd0] ss:$24 sps:$4 sm:$0xff]  }
 0x166   : > { %v5421_v8 = vpop.f32.mrf.mxu1 }
 0x167   : > { %v5423_v39 = vpop.f32.mrf.mxu0 }
 0x168   : > { %v5425_v15 = vpop.f32.mrf.mxu1 }
 0x169   : > { %v5427_v48 = vpop.f32.mrf.mxu0 }
 0x16a   : > { %v5429_v17 = vpop.f32.mrf.mxu1 }
 0x16b   : > { %v5431_v1 = vpop.f32.mrf.mxu0 }
 0x16c   : > { %v5433_v58 = vpop.f32.mrf.mxu1 }
 0x16d   : > { %v3927_v13 = vpop.f32.mrf.mxu0 }
 0x16e   : > { %v4165_v26 = vpop.f32.mrf.mxu1 }
 0x16f   : > { %v3928_v20 = vpop.f32.mrf.mxu0 }
 0x170   : > { %v3929_v16 = vadd.f32 %v3928_v20, %v3927_v13  ;;  %v1484_v9 = vpop.f32.mrf.mxu1  ;;  %v1363_v13 = vadd.f32 %v3895_v32, %v3855_v41  ;;  %v3901_v41 = vadd.f32 %v3900_v11, %v3899_v51 }
 0x171   : > { %v3930_v37 = vpop.f32.mrf.mxu0 }
 0x172   : > { %v4166_v3 = vpop.f32.mrf.mxu1  ;;  %v1420_v5 = vadd.f32 %v3929_v16, %v1355_v18 }
 0x173   : > { %v3931_v62 = vpop.f32.mrf.mxu0 }
 0x174   : > { %v3932_v31 = vadd.f32 %v3931_v62, %v3930_v37  ;;  %v1487_v25 = vpop.f32.mrf.mxu1  ;;  %v1485_v42 = vadd.f32 %v1484_v9, %v1420_v5  ;;  %v1366_v62 = vadd.f32 %v3898_v34, %v3858_v6  ;;  %v3861_v5 = vadd.f32 %v3860_v7, %v3859_v2  ;;  %v4434_v9 = vld [vmem:[#allocation7 + $0x104] ss:$24 sps:$4 sm:$0xff]   ;;  %v4437_v2 = vld [vmem:[#allocation7 + $0xd4] ss:$24 sps:$4 sm:$0xff]  }
 0x175   : > { %v3933_v57 = vpop.f32.mrf.mxu0 }
 0x176   : > { %v1423_v44 = vadd.f32 %v3932_v31, %v1358_v10  ;;  %v5437_v16 = vpop.f32.mrf.mxu1  ;;  %v3864_v10 = vadd.f32 %v3863_v43, %v3862_v46  ;;  %v1371_v0 = vadd.f32 %v3901_v41, %v3861_v5  ;;  %v3907_v43 = vadd.f32 %v5425_v15, %v5421_v8  ;;  %v4449_v5 = vld [vmem:[#allocation7 + $0x14] ss:$24 sps:$4 sm:$0xff]   ;;  %v4447_v41 = vld [vmem:[#allocation7 + $0x10] ss:$24 sps:$4 sm:$0xff]  }
 0x177   : > { %v3934_v29 = vpop.f32.mrf.mxu0 }
 0x178   : > { %v1488_v45 = vadd.f32 %v1487_v25, %v1423_v44  ;;  %v3935_v30 = vadd.f32 %v3934_v29, %v3933_v57  ;;  %v4429_v44 = vld [vmem:[#allocation7 + $0x130] ss:$24 sps:$4 sm:$0xff]   ;;  %v6242_v57 = vmov 0   ;;  %v1500_v6 = vpop.f32.mrf.mxu1  ;;  %v1374_v11 = vadd.f32 %v3904_v24, %v3864_v10  ;;  %v4458_v24 = vld [vmem:[%s6087_s4 + $0x20] sm:$0xff]  }
 0x179   : > { %v3936_v35 = vpop.f32.mrf.mxu0  ;;  %v3870_v29 = vadd.f32 %v5431_v1, %v5427_v48  ;;  %v4441_v48 = vld [vmem:[#allocation7 + $0x70] ss:$24 sps:$4 sm:$0xff]   ;;  %v4446_v1 = vld [vmem:[#allocation7 + $0x44] ss:$24 sps:$4 sm:$0xff]  }
 0x17a   : > { %v5435_v54 = vpack.c.bf16 %v1488_v45, %v1485_v42  ;;  %v1428_v18 = vadd.f32 %v3935_v30, %v1363_v13  ;;  %v4170_v51 = vpop.f32.mrf.mxu1  ;;  %v3910_v45 = vadd.f32 %v5433_v58, %v5429_v17  ;;  %v4443_v13 = vld [vmem:[#allocation7 + $0x74] ss:$24 sps:$4 sm:$0xff]  }
 0x17b   : > { %v3937_v22 = vpop.f32.mrf.mxu0  ;;  %v4455_v10 = vld [vmem:[%s6087_s4 + $0x28] sm:$0xff]  }
 0x17c   : > { %v3938_v37 = vadd.f32 %v3937_v22, %v3936_v35  ;;  %1872 = vmatmul.mubr.bf16.vlgmr.msra.gmra.mxu0 %v5435_v54  ;;  %1945 = vmatmul.mubr.bf16.vlgmr.msra.gmra.mxu1 %v5435_v54  ;;  %v1493_v23 = vadd.f32 %v4165_v26, %v1428_v18  ;;  %v4440_v26 = vld [vmem:[#allocation7 + $0xa4] ss:$24 sps:$4 sm:$0xff]   ;;  %v1503_v34 = vpop.f32.mrf.mxu1  ;;  %v1382_v22 = vadd.f32 %v3910_v45, %v3870_v29 }
 0x17d   : > { %v3939_v31 = vpop.f32.mrf.mxu0  ;;  %1986 = vmatpush1.bf16.msra.mxu0 %v4426_v36  ;;  %1881 = vmatprep.mubr.bf16.mxu0 %v6242_v57 }
 0x17e   : > { %v1431_v32 = vadd.f32 %v3938_v37, %v1366_v62  ;;  %1987 = vmatprep.subr.bf16.mxu0 %v4431_v49  ;;  %1954 = vmatprep.mubr.bf16.mxu1 %v6242_v57 }
 0x17f   : > { %v3940_v28 = vpop.f32.mrf.mxu0 }
 0x180   : > { %v1496_v38 = vadd.f32 %v4166_v3, %v1431_v32  ;;  %v3941_v61 = vadd.f32 %v3940_v28, %v3939_v31  ;;  %v3867_v3 = vadd.f32 %v5423_v39, %v5419_v12  ;;  %v4438_v39 = vld [vmem:[#allocation7 + $0xa0] ss:$24 sps:$4 sm:$0xff]  }
 0x181   : > { %v3942_v40 = vpop.f32.mrf.mxu0  ;;  %1988 = vmatpush1.bf16.msra.mxu0 %v4429_v44  ;;  %v4444_v31 = vld [vmem:[#allocation7 + $0x40] ss:$24 sps:$4 sm:$0xff]  }
 0x182   : > { %v1516_v20 = vpack.c.bf16 %v1496_v38, %v1493_v23  ;;  %1989 = vmatprep.subr.bf16.mxu0 %v4434_v9  ;;  %v1436_v55 = vadd.f32 %v3941_v61, %v1371_v0  ;;  %v1379_v8 = vadd.f32 %v3907_v43, %v3867_v3  ;;  %v4451_v32 = vld [vmem:[%s6087_s4 + $0x38] sm:$0xff]   ;;  %v4453_v9 = vld [vmem:[%s6087_s4 + $0x30] sm:$0xff]   ;;  %v4457_v28 = vld [vmem:[%s6087_s4 + $0x60] sm:$0xff]  }
 0x183   : > { %v3943_v7 = vpop.f32.mrf.mxu0  ;;  %v4459_v23 = vld [vmem:[%s6087_s4 + $0xb0] sm:$0xff]   ;;  %v4460_v38 = vld [vmem:[%s6087_s4 + $0x58] sm:$0xff]  }
 0x184   : > { %v3944_v25 = vadd.f32 %v3943_v7, %v3942_v40  ;;  %1882 = vmatmul.mubr.bf16.gmra.mxu0 %v1516_v20  ;;  %1955 = vmatmul.mubr.bf16.gmra.mxu1 %v1516_v20  ;;  %v1501_v30 = vadd.f32 %v1500_v6, %v1436_v55  ;;  %v4456_v6 = vld [vmem:[%s6087_s4 + $0xb8] sm:$0xff]   ;;  %v4462_v40 = vld [vmem:[%s6087_s4 + $0xa8] sm:$0xff]   ;;  %v4464_v0 = vld [vmem:[%s6087_s4 + $0x10] sm:$0xff]  }
 0x185   : > { %v3945_v46 = vpop.f32.mrf.mxu0  ;;  %1990 = vmatpush1.bf16.msra.mxu0 %v4432_v56  ;;  %1891 = vmatprep.mubr.bf16.mxu0 %v6242_v57  ;;  %v4461_v61 = vld [vmem:[%s6087_s4 + $0x18] sm:$0xff]   ;;  %v4463_v56 = vld [vmem:[%s6087_s4 + $0x50] sm:$0xff]   ;;  %v4470_v55 = vld [vmem:[%s6087_s4] sm:$0xff]  }
 0x186   : > { %v1439_v52 = vadd.f32 %v3944_v25, %v1374_v11  ;;  %1991 = vmatprep.subr.bf16.mxu0 %v4437_v2  ;;  %1964 = vmatprep.mubr.bf16.mxu1 %v6242_v57  ;;  %v4466_v2 = vld [vmem:[%s6087_s4 + $0x48] sm:$0xff]   ;;  %v4468_v7 = vld [vmem:[%s6087_s4 + $0x98] sm:$0xff]   ;;  %v4469_v11 = vld [vmem:[%s6087_s4 + $0x40] sm:$0xff]  }
 0x187   : > { %v3946_v42 = vpop.f32.mrf.mxu0  ;;  %v4471_v25 = vld [vmem:[%s6087_s4 + $0x90] sm:$0xff]  }
 0x188   : > { %v1504_v35 = vadd.f32 %v1503_v34, %v1439_v52  ;;  %v3947_v36 = vadd.f32 %v3946_v42, %v3945_v46  ;;  %v4472_v46 = vld [vmem:[%s6087_s4 + $0x88] sm:$0xff]  }
 0x189   : > { %v3948_v12 = vpop.f32.mrf.mxu0  ;;  %1992 = vmatpush1.bf16.msra.mxu0 %v4435_v60  ;;  %v4473_v60 = vld [vmem:[%s6087_s4 + $0x80] sm:$0xff]  }
 0x18a   : > { %v1517_v15 = vpack.c.bf16 %v1504_v35, %v1501_v30  ;;  %1993 = vmatprep.subr.bf16.mxu0 %v4440_v26  ;;  %v1444_v62 = vadd.f32 %v3947_v36, %v1379_v8 }
 0x18b   : > { %v3949_v49 = vpop.f32.mrf.mxu0 }
 0x18c   : > { %v3950_v18 = vadd.f32 %v3949_v49, %v3948_v12  ;;  %1892 = vmatmul.mubr.bf16.gmra.mxu0 %v1517_v15  ;;  %1965 = vmatmul.mubr.bf16.gmra.mxu1 %v1517_v15  ;;  %v1509_v58 = vadd.f32 %v5437_v16, %v1444_v62  ;;  %v4450_v16 = vld [vmem:[%s6087_s4 + $0x78] sm:$0xff]  }
 0x18d   : > { %1994 = vmatpush1.bf16.msra.mxu0 %v4438_v39  ;;  %1901 = vmatprep.mubr.bf16.mxu0 %v6242_v57 }
 0x18e   : > { %v1447_v17 = vadd.f32 %v3950_v18, %v1382_v22  ;;  %1995 = vmatprep.subr.bf16.mxu0 %v4443_v13  ;;  %1974 = vmatprep.mubr.bf16.mxu1 %v6242_v57 }
 0x18f   : > { %3963 = vmatprep.subr.bf16.mxu1 %v4450_v16  ;;  %v1583_v16 = vsub.s32 3, %v4939_v21 }
 0x190   : > { %v1512_v37 = vadd.f32 %v4170_v51, %v1447_v17  ;;  %3964 = vmatpush3.bf16.msra.mxu1 %v4451_v32  ;;  %v4467_v51 = vld [vmem:[%s6087_s4 + $0x8] sm:$0xff]  }
 0x191   : > { %1996 = vmatpush1.bf16.msra.mxu0 %v4441_v48  ;;  %v1571_v48 = vsub.s32 0, %v4939_v21 }
 0x192   : > { %v1518_v44 = vpack.c.bf16 %v1512_v37, %v1509_v58  ;;  %1997 = vmatprep.subr.bf16.mxu0 %v4446_v1  ;;  %v1567_v1 = vld [vmem:[%s6086_s3] sm:$0x3f]  ;;  %v1575_v58 = vsub.s32 1, %v4939_v21  ;;  %v1579_v37 = vsub.s32 2, %v4939_v21 }
 0x194   : > { %1902 = vmatmul.mubr.bf16.gmra.mxu0 %v1518_v44  ;;  %1975 = vmatmul.mubr.bf16.gmra.mxu1 %v1518_v44 }
 0x195   : > { %1998 = vmatpush1.bf16.msra.mxu0 %v4444_v31  ;;  %2017 = vmatprep.mubr.bf16.mxu0 %v6242_v57 }
 0x196   : > { %1999 = vmatprep.subr.bf16.mxu0 %v4449_v5  ;;  %v1587_v5 = vsub.s32 4, %v4939_v21 }
 0x199   : > { %2000 = vmatpush1.bf16.msra.mxu0 %v4447_v41  ;;  %v5561_v41 = vrot.slane %v1567_v1, %v1571_v48 }
 0x19a   : > { %4171 = vmatprep.subr.bf16.mxu0 %v4456_v6 }
 0x19c   : > { %2018 = vmatmul.mubr.bf16.vlgmr.msra.gmra.mxu0 %v5435_v54  ;;  %v4452_v54 = vld [vmem:[%s6087_s4 + $0x70] sm:$0xff]  }
 0x19d   : > { %2027 = vmatprep.mubr.bf16.mxu0 %v6242_v57  ;;  %3965 = vmatprep.subr.bf16.mxu1 %v4452_v54  ;;  %v5566_v54 = vrot.slane %v1567_v1, %v1575_v58 }
 0x19e   : > { %3966 = vmatpush3.bf16.msra.mxu1 %v4453_v9  ;;  %4172 = vmatpush3.bf16.msra.mxu0 %v4456_v6  ;;  %v1591_v9 = vsub.s32 5, %v4939_v21 }
 0x19f   : > { %4173 = vmatprep.subr.bf16.mxu0 %v4459_v23 }
 0x1a2   : > { %4174 = vmatpush3.bf16.msra.mxu0 %v4459_v23 }
 0x1a3   : > { %4175 = vmatprep.subr.bf16.mxu0 %v4462_v40 }
 0x1a4   : > { %2028 = vmatmul.mubr.bf16.gmra.mxu0 %v1516_v20  ;;  %v4465_v20 = vld [vmem:[%s6087_s4 + $0xa0] sm:$0xff]  }
 0x1a5   : > { %2037 = vmatprep.mubr.bf16.mxu0 %v6242_v57 }
 0x1a6   : > { %4176 = vmatpush3.bf16.msra.mxu0 %v4462_v40 }
 0x1a7   : > { %4177 = vmatprep.subr.bf16.mxu0 %v4465_v20 }
 0x1aa   : > { %4178 = vmatpush3.bf16.msra.mxu0 %v4465_v20 }
 0x1ab   : > { %4179 = vmatprep.subr.bf16.mxu0 %v4468_v7 }
 0x1ac   : > { %2038 = vmatmul.mubr.bf16.gmra.mxu0 %v1517_v15 }
 0x1ad   : > { %2047 = vmatprep.mubr.bf16.mxu0 %v6242_v57  ;;  %v4454_v57 = vld [vmem:[%s6087_s4 + $0x68] sm:$0xff]  }
 0x1ae   : > { %3967 = vmatprep.subr.bf16.mxu1 %v4454_v57  ;;  %4180 = vmatpush3.bf16.msra.mxu0 %v4468_v7  ;;  %v5569_v57 = vrot.slane %v1567_v1, %v1579_v37 }
 0x1af   : > { %3968 = vmatpush3.bf16.msra.mxu1 %v4455_v10  ;;  %4181 = vmatprep.subr.bf16.mxu0 %v4471_v25 }
 0x1b0   : > { %3969 = vmatprep.subr.bf16.mxu1 %v4457_v28 }
 0x1b2   : > { %4182 = vmatpush3.bf16.msra.mxu0 %v4471_v25 }
 0x1b3   : > { %3970 = vmatpush3.bf16.msra.mxu1 %v4458_v24  ;;  %4183 = vmatprep.subr.bf16.mxu0 %v4472_v46  ;;  %v5576_v24 = vrot.slane %v1567_v1, %v1587_v5 }
 0x1b4   : > { %2048 = vmatmul.mubr.bf16.gmra.mxu0 %v1518_v44  ;;  %3971 = vmatprep.subr.bf16.mxu1 %v4460_v38  ;;  %v5579_v38 = vrot.slane %v1567_v1, %v1583_v16 }
 0x1b6   : > { %4184 = vmatpush3.bf16.msra.mxu0 %v4472_v46 }
 0x1b7   : > { %3972 = vmatpush3.bf16.msra.mxu1 %v4461_v61  ;;  %4185 = vmatprep.subr.bf16.mxu0 %v4473_v60 }
 0x1b8   : > { %3973 = vmatprep.subr.bf16.mxu1 %v4463_v56 }
 0x1ba   : > { %4186 = vmatpush3.bf16.msra.mxu0 %v4473_v60 }
 0x1bb   : > { %3974 = vmatpush3.bf16.msra.mxu1 %v4464_v0  ;;  %v5583_v0 = vrot.slane %v1567_v1, %v1591_v9 }
 0x1bc   : > { %3975 = vmatprep.subr.bf16.mxu1 %v4466_v2 }
 0x1bf   : > { %3976 = vmatpush3.bf16.msra.mxu1 %v4467_v51 }
 0x1c0   : > { %3977 = vmatprep.subr.bf16.mxu1 %v4469_v11 }
 0x1c3   : > { %3978 = vmatpush3.bf16.msra.mxu1 %v4470_v55 }
 0x23c   : > { %v1873_v3 = vpop.f32.mrf.mxu0  ;;  %v1946_v43 = vpop.f32.mrf.mxu1 }
 0x23d   : > { %v1874_v23 = vadd.f32 %v1873_v3, %v5561_v41  ;;  %v1947_v20 = vadd.f32 %v1946_v43, %v5569_v57 }
 0x23e   : > { %v1875_v52 = vpop.f32.mrf.mxu0  ;;  %v1948_v26 = vpop.f32.mrf.mxu1 }
 0x23f   : > { %v1876_v40 = vadd.f32 %v1875_v52, %v5566_v54  ;;  %v2058_v46 = vmax.f32 %v1874_v23, 0.0  ;;  %v1949_v60 = vadd.f32 %v1948_v26, %v5579_v38  ;;  %v2060_v48 = vmax.f32 %v1947_v20, 0.0 }
 0x240   : > { %v1877_v29 = vpop.f32.mrf.mxu0  ;;  %v1950_v34 = vpop.f32.mrf.mxu1 }
 0x241   : > { %v1878_v10 = vadd.f32 %v1877_v29, %v5561_v41  ;;  %v1951_v11 = vadd.f32 %v1950_v34, %v5569_v57  ;;  %v2059_v52 = vmax.f32 %v1876_v40, 0.0 }
 0x242   : > { %v1879_v42 = vpop.f32.mrf.mxu0  ;;  %v1952_v45 = vpop.f32.mrf.mxu1 }
 0x243   : > { %v1880_v56 = vadd.f32 %v1879_v42, %v5566_v54  ;;  %v2061_v2 = vmax.f32 %v1878_v10, 0.0  ;;  %v1953_v51 = vadd.f32 %v1952_v45, %v5579_v38  ;;  %v2063_v34 = vmax.f32 %v1951_v11, 0.0 }
 0x244   : > { %v1883_v30 = vpop.f32.mrf.mxu0  ;;  %v5534_v36 = vpop.f32.mrf.mxu1  ;;  %v2082_v10 = vmul.f32 %v2058_v46, %v1949_v60 }
 0x245   : > { %v2062_v29 = vmax.f32 %v1880_v56, 0.0  ;;  %v2085_v1 = vmul.f32 %v2061_v2, %v1953_v51  ;;  %v1884_v26 = vadd.f32 %v1883_v30, %v5561_v41 }
 0x246   : > { %v1885_v35 = vpop.f32.mrf.mxu0  ;;  %v5536_v8 = vpop.f32.mrf.mxu1 }
 0x247   : > { %v1886_v23 = vadd.f32 %v1885_v35, %v5566_v54  ;;  %v2106_v51 = vpack.c.bf16 %v2085_v1, %v2082_v10  ;;  %v2064_v60 = vmax.f32 %v1884_v26, 0.0 }
 0x248   : > { %v1887_v12 = vpop.f32.mrf.mxu0  ;;  %v5542_v49 = vpop.f32.mrf.mxu1 }
 0x249   : > { %v1888_v45 = vadd.f32 %v1887_v12, %v5561_v41  ;;  %v1957_v12 = vadd.f32 %v5534_v36, %v5569_v57  ;;  %v1961_v46 = vadd.f32 %v5542_v49, %v5569_v57  ;;  %v2065_v36 = vmax.f32 %v1886_v23, 0.0 }
 0x24a   : > { %v1889_v39 = vpop.f32.mrf.mxu0  ;;  %v1962_v18 = vpop.f32.mrf.mxu1 }
 0x24b   : > { %v1890_v40 = vadd.f32 %v1889_v39, %v5566_v54  ;;  %v1963_v11 = vadd.f32 %v1962_v18, %v5579_v38  ;;  %v2066_v49 = vmax.f32 %v1957_v12, 0.0 }
 0x24c   : > { %v5538_v15 = vpop.f32.mrf.mxu0  ;;  %v5558_v44 = vpop.f32.mrf.mxu1 }
 0x24e   : > { %v5540_v13 = vpop.f32.mrf.mxu0  ;;  %v5574_v28 = vpop.f32.mrf.mxu1 }
 0x24f   : > { %v1896_v10 = vadd.f32 %v5540_v13, %v5566_v54 }
 0x250   : > { %v5544_v22 = vpop.f32.mrf.mxu0  ;;  %v5588_v55 = vpop.f32.mrf.mxu1 }
 0x252   : > { %v5546_v62 = vpop.f32.mrf.mxu0  ;;  %v1972_v37 = vpop.f32.mrf.mxu1 }
 0x253   : > { %v1900_v23 = vadd.f32 %v5546_v62, %v5566_v54 }
 0x254   : > { %v5549_v17 = vpop.f32.mrf.mxu0  ;;  %v5604_v30 = vpop.f32.mrf.mxu1 }
 0x256   : > { %v5556_v31 = vpop.f32.mrf.mxu0 }
 0x258   : > { %v5564_v32 = vpop.f32.mrf.mxu0 }
 0x25a   : > { %v5572_v6 = vpop.f32.mrf.mxu0 }
 0x25c   : > { %v2019_v61 = vpop.f32.mrf.mxu0 }
 0x25d   : > { %v2020_v25 = vadd.f32 %v2019_v61, %v5576_v24 }
 0x25e   : > { %v2021_v7 = vpop.f32.mrf.mxu0 }
 0x25f   : > { %v2022_v42 = vadd.f32 %v2021_v7, %v5583_v0  ;;  %v2083_v5 = vmul.f32 %v2059_v52, %v2020_v25  ;;  %v2067_v7 = vmax.f32 %v1888_v45, 0.0  ;;  %v2069_v45 = vmax.f32 %v1961_v46, 0.0 }
 0x260   : > { %v2023_v3 = vpop.f32.mrf.mxu0 }
 0x261   : > { %v2024_v43 = vadd.f32 %v2023_v3, %v5576_v24  ;;  %v2084_v56 = vmul.f32 %v2060_v48, %v2022_v42  ;;  %v1959_v3 = vadd.f32 %v5536_v8, %v5579_v38  ;;  %v1898_v48 = vadd.f32 %v5544_v22, %v5561_v41 }
 0x262   : > { %v2025_v58 = vpop.f32.mrf.mxu0 }
 0x263   : > { %v2086_v16 = vmul.f32 %v2062_v29, %v2024_v43  ;;  %v2026_v9 = vadd.f32 %v2025_v58, %v5583_v0  ;;  %v2068_v29 = vmax.f32 %v1890_v40, 0.0  ;;  %v2091_v43 = vmul.f32 %v2067_v7, %v1963_v11  ;;  %v1978_v58 = vpop.f32.mrf.mxu1 }
 0x264   : > { %v2029_v61 = vpop.f32.mrf.mxu0 }
 0x265   : > { %v2087_v20 = vmul.f32 %v2063_v34, %v2026_v9  ;;  %v2107_v2 = vpack.c.bf16 %v2086_v16, %v2083_v5  ;;  %v2030_v35 = vadd.f32 %v2029_v61, %v5576_v24  ;;  %v2088_v16 = vmul.f32 %v2064_v60, %v1959_v3  ;;  %v1980_v7 = vpop.f32.mrf.mxu1 }
 0x266   : > { %v2031_v25 = vpop.f32.mrf.mxu0  ;;  %v1894_v9 = vadd.f32 %v5538_v15, %v5561_v41  ;;  %v1971_v15 = vadd.f32 %v5588_v55, %v5569_v57  ;;  %v1908_v3 = vadd.f32 %v5564_v32, %v5561_v41 }
 0x267   : > { %2349 = vmatprep.mubr.bf16.mxu1 %v2107_v2  ;;  %v2108_v39 = vpack.c.bf16 %v2087_v20, %v2084_v56  ;;  %v2032_v18 = vadd.f32 %v2031_v25, %v5583_v0  ;;  %v2089_v34 = vmul.f32 %v2065_v36, %v2030_v35  ;;  %v1967_v56 = vadd.f32 %v5558_v44, %v5569_v57 }
 0x268   : > { %v2033_v52 = vpop.f32.mrf.mxu0  ;;  %2350 = vmatmul.mubr.bf16.vlgmr.msra.gmra.mxu1 %v2106_v51  ;;  %v2073_v20 = vmax.f32 %v1898_v48, 0.0  ;;  %v1973_v2 = vadd.f32 %v1972_v37, %v5579_v38  ;;  %v2109_v12 = vpack.c.bf16 %v2091_v43, %v2088_v16  ;;  %v2070_v62 = vmax.f32 %v1894_v9, 0.0 }
 0x269   : > { %v2034_v42 = vadd.f32 %v2033_v52, %v5576_v24  ;;  %4187 = vmatprep.mubr.bf16.mxu0 %v2108_v39  ;;  %v2090_v61 = vmul.f32 %v2066_v49, %v2032_v18  ;;  %v1969_v25 = vadd.f32 %v5574_v28, %v5579_v38  ;;  %v2071_v44 = vmax.f32 %v1896_v10, 0.0 }
 0x26a   : > { %v2035_v1 = vpop.f32.mrf.mxu0  ;;  %v2074_v35 = vmax.f32 %v1900_v23, 0.0  ;;  %v2072_v60 = vmax.f32 %v1967_v56, 0.0  ;;  %v2097_v55 = vmul.f32 %v2073_v20, %v1973_v2  ;;  %v2075_v36 = vmax.f32 %v1971_v15, 0.0 }
 0x26b   : > { %v2092_v5 = vmul.f32 %v2068_v29, %v2034_v42  ;;  %v2036_v8 = vadd.f32 %v2035_v1, %v5583_v0  ;;  %v1982_v29 = vpop.f32.mrf.mxu1  ;;  %v2094_v49 = vmul.f32 %v2070_v62, %v1969_v25  ;;  %v1904_v43 = vadd.f32 %v5549_v17, %v5561_v41  ;;  %v4474_v25 = vld [vmem:[#allocation8 + $0xf8] sm:$0xff]  }
 0x26c   : > { %v2039_v26 = vpop.f32.mrf.mxu0  ;;  %v1906_v48 = vadd.f32 %v5556_v31, %v5566_v54  ;;  %v2079_v16 = vmax.f32 %v1908_v3, 0.0  ;;  %v1983_v9 = vadd.f32 %v1982_v29, %v5579_v38  ;;  %v1981_v17 = vadd.f32 %v1980_v7, %v5569_v57  ;;  %4055 = vmatprep.subr.bf16.mxu0 %v4474_v25  ;;  %v4484_v3 = vld [vmem:[#allocation8 + $0xa8] sm:$0xff]   ;;  %v4487_v29 = vld [vmem:[#allocation8 + $0x60] sm:$0xff]  }
 0x26d   : > { %v2093_v22 = vmul.f32 %v2069_v45, %v2036_v8  ;;  %v2110_v40 = vpack.c.bf16 %v2092_v5, %v2089_v34  ;;  %v2040_v11 = vadd.f32 %v2039_v26, %v5576_v24  ;;  %v1910_v45 = vadd.f32 %v5572_v6, %v5566_v54 }
 0x26e   : > { %v2041_v51 = vpop.f32.mrf.mxu0  ;;  %v1977_v8 = vadd.f32 %v5604_v30, %v5569_v57  ;;  %v2112_v26 = vpack.c.bf16 %v2097_v55, %v2094_v49  ;;  %v2076_v23 = vmax.f32 %v1904_v43, 0.0  ;;  %v1979_v54 = vadd.f32 %v1978_v58, %v5579_v38  ;;  %v4483_v55 = vld [vmem:[#allocation8 + $0x68] sm:$0xff]   ;;  %v4491_v49 = vld [vmem:[#allocation8 + $0x58] sm:$0xff]  }
 0x26f   : > { %v2111_v13 = vpack.c.bf16 %v2093_v22, %v2090_v61  ;;  %2357 = vmatprep.mubr.bf16.mxu1 %v2110_v40  ;;  %v2042_v37 = vadd.f32 %v2041_v51, %v5583_v0  ;;  %v2095_v18 = vmul.f32 %v2071_v44, %v2040_v11  ;;  %v2077_v61 = vmax.f32 %v1906_v48, 0.0  ;;  %v4477_v44 = vld [vmem:[#allocation8 + $0x38] sm:$0xff]  }
 0x270   : > { %v2043_v46 = vpop.f32.mrf.mxu0  ;;  %2358 = vmatmul.mubr.bf16.gmra.mxu1 %v2109_v12  ;;  %v2080_v22 = vmax.f32 %v1910_v45, 0.0  ;;  %v2078_v56 = vmax.f32 %v1977_v8, 0.0  ;;  %v2103_v20 = vmul.f32 %v2079_v16, %v1983_v9  ;;  %v2081_v57 = vmax.f32 %v1981_v17, 0.0  ;;  %v4492_v43 = vld [vmem:[#allocation8 + $0x98] sm:$0xff]   ;;  %v4495_v45 = vld [vmem:[#allocation8 + $0x50] sm:$0xff]   ;;  %v4499_v8 = vld [vmem:[#allocation8 + $0x48] sm:$0xff]  }
 0x271   : > { %v2044_v39 = vadd.f32 %v2043_v46, %v5576_v24  ;;  %4188 = vmatmul.mubr.bf16.vlgmr.msra.gmra.mxu0 %v2111_v13  ;;  %v2096_v34 = vmul.f32 %v2072_v60, %v2042_v37  ;;  %v2100_v7 = vmul.f32 %v2076_v23, %v1979_v54  ;;  %v4476_v46 = vld [vmem:[#allocation8 + $0xb8] sm:$0xff]   ;;  %v4479_v37 = vld [vmem:[#allocation8 + $0x70] sm:$0xff]   ;;  %v4482_v60 = vld [vmem:[#allocation8 + $0xe8] sm:$0xff]  }
 0x272   : > { %v2045_v52 = vpop.f32.mrf.mxu0  ;;  %4056 = vmatpush3.bf16.msra.mxu0 %v4476_v46  ;;  %v4493_v48 = vld [vmem:[#allocation8 + $0x18] sm:$0xff]   ;;  %v4500_v16 = vld [vmem:[#allocation8 + $0x88] sm:$0xff]   ;;  %v4504_v17 = vld [vmem:[#allocation8 + $0x80] sm:$0xff]  }
 0x273   : > { %v2098_v42 = vmul.f32 %v2074_v35, %v2044_v39  ;;  %v2046_v28 = vadd.f32 %v2045_v52, %v5583_v0  ;;  %v2115_v11 = vpack.c.bf16 %v2103_v20, %v2100_v7  ;;  %v4478_v35 = vld [vmem:[#allocation8 + $0xf0] sm:$0xff]   ;;  %v4485_v52 = vld [vmem:[#allocation8 + $0x28] sm:$0xff]   ;;  %v4507_v23 = vld [vmem:[#allocation8 + $0x178] sm:$0xff]  }
 0x274   : > { %v2049_v1 = vpop.f32.mrf.mxu0  ;;  %4057 = vmatprep.subr.bf16.mxu0 %v4478_v35  ;;  %v4481_v39 = vld [vmem:[#allocation8 + $0x30] sm:$0xff]   ;;  %v4501_v9 = vld [vmem:[#allocation8 + $0x8] sm:$0xff]  }
 0x275   : > { %v2099_v32 = vmul.f32 %v2075_v36, %v2046_v28  ;;  %v2113_v5 = vpack.c.bf16 %v2098_v42, %v2095_v18  ;;  %v2050_v41 = vadd.f32 %v2049_v1, %v5576_v24  ;;  %v4486_v36 = vld [vmem:[#allocation8 + $0xe0] sm:$0xff]   ;;  %v4490_v28 = vld [vmem:[#allocation8 + $0xd8] sm:$0xff]   ;;  %v4494_v1 = vld [vmem:[#allocation8 + $0xd0] sm:$0xff]  }
 0x276   : > { %v2051_v10 = vpop.f32.mrf.mxu0  ;;  %v4488_v18 = vld [vmem:[#allocation8 + $0xa0] sm:$0xff]  }
 0x277   : > { %2365 = vmatprep.mubr.bf16.mxu1 %v2113_v5  ;;  %v2114_v31 = vpack.c.bf16 %v2099_v32, %v2096_v34  ;;  %v2052_v30 = vadd.f32 %v2051_v10, %v5583_v0  ;;  %v2101_v51 = vmul.f32 %v2077_v61, %v2050_v41  ;;  %v4489_v42 = vld [vmem:[#allocation8 + $0x20] sm:$0xff]   ;;  %v4496_v34 = vld [vmem:[#allocation8 + $0x90] sm:$0xff]   ;;  %v4498_v5 = vld [vmem:[#allocation8 + $0xc8] sm:$0xff]  }
 0x278   : > { %v2053_v6 = vpop.f32.mrf.mxu0  ;;  %2366 = vmatmul.mubr.bf16.gmra.mxu1 %v2112_v26  ;;  %v4497_v32 = vld [vmem:[#allocation8 + $0x10] sm:$0xff]   ;;  %v4502_v10 = vld [vmem:[#allocation8 + $0xc0] sm:$0xff]  }
 0x279   : > { %v2054_v40 = vadd.f32 %v2053_v6, %v5576_v24  ;;  %4191 = vmatprep.mubr.bf16.mxu0 %v2114_v31  ;;  %v2102_v13 = vmul.f32 %v2078_v56, %v2052_v30  ;;  %v4475_v24 = vld [vmem:[#allocation8 + $0x78] sm:$0xff]   ;;  %v4503_v26 = vld [vmem:[#allocation8 + $0x40] sm:$0xff]  }
 0x27a   : > { %v2055_v2 = vpop.f32.mrf.mxu0  ;;  %4015 = vmatprep.subr.bf16.mxu1 %v4475_v24  ;;  %v4505_v41 = vld [vmem:[#allocation8] sm:$0xff]   ;;  %v5648_v31 = vld [vmem:[#allocation8 + $0x1b8] sm:$0xff]  }
 0x27b   : > { %v2104_v12 = vmul.f32 %v2080_v22, %v2054_v40  ;;  %v2056_v15 = vadd.f32 %v2055_v2, %v5583_v0  ;;  %4016 = vmatpush3.bf16.msra.mxu1 %v4477_v44  ;;  %v4480_v0 = vld [vmem:[#allocation8 + $0xb0] sm:$0xff]  }
 0x27c   : > { %4017 = vmatprep.subr.bf16.mxu1 %v4479_v37  ;;  %4058 = vmatpush3.bf16.msra.mxu0 %v4480_v0 }
 0x27d   : > { %v2105_v38 = vmul.f32 %v2081_v57, %v2056_v15  ;;  %v2116_v58 = vpack.c.bf16 %v2104_v12, %v2101_v51  ;;  %4059 = vmatprep.subr.bf16.mxu0 %v4482_v60  ;;  %v5654_v57 = vld [vmem:[%s6088_s5] ss:$0 sm:$0xff] }
 0x27f   : > { %2373 = vmatprep.mubr.bf16.mxu1 %v2116_v58  ;;  %v2117_v62 = vpack.c.bf16 %v2105_v38, %v2102_v13  ;;  %4018 = vmatpush3.bf16.msra.mxu1 %v4481_v39 }
 0x280   : > { %2374 = vmatmul.mubr.bf16.gmra.mxu1 %v2115_v11  ;;  %4019 = vmatprep.subr.bf16.mxu1 %v4483_v55 }
 0x281   : > { %4192 = vmatmul.mubr.bf16.gmra.mxu0 %v2117_v62 }
 0x282   : > { %4060 = vmatpush3.bf16.msra.mxu0 %v4484_v3 }
 0x283   : > { %4020 = vmatpush3.bf16.msra.mxu1 %v4485_v52  ;;  %4061 = vmatprep.subr.bf16.mxu0 %v4486_v36 }
 0x284   : > { %4021 = vmatprep.subr.bf16.mxu1 %v4487_v29 }
 0x286   : > { %4062 = vmatpush3.bf16.msra.mxu0 %v4488_v18 }
 0x287   : > { %4022 = vmatpush3.bf16.msra.mxu1 %v4489_v42  ;;  %4063 = vmatprep.subr.bf16.mxu0 %v4490_v28 }
 0x288   : > { %4023 = vmatprep.subr.bf16.mxu1 %v4491_v49 }
 0x28a   : > { %4064 = vmatpush3.bf16.msra.mxu0 %v4492_v43 }
 0x28b   : > { %4024 = vmatpush3.bf16.msra.mxu1 %v4493_v48  ;;  %4065 = vmatprep.subr.bf16.mxu0 %v4494_v1 }
 0x28c   : > { %4025 = vmatprep.subr.bf16.mxu1 %v4495_v45 }
 0x28e   : > { %4066 = vmatpush3.bf16.msra.mxu0 %v4496_v34 }
 0x28f   : > { %4026 = vmatpush3.bf16.msra.mxu1 %v4497_v32  ;;  %4067 = vmatprep.subr.bf16.mxu0 %v4498_v5 }
 0x290   : > { %4027 = vmatprep.subr.bf16.mxu1 %v4499_v8 }
 0x292   : > { %4068 = vmatpush3.bf16.msra.mxu0 %v4500_v16 }
 0x293   : > { %4028 = vmatpush3.bf16.msra.mxu1 %v4501_v9  ;;  %4069 = vmatprep.subr.bf16.mxu0 %v4502_v10 }
 0x294   : > { %4029 = vmatprep.subr.bf16.mxu1 %v4503_v26 }
 0x296   : > { %4070 = vmatpush3.bf16.msra.mxu0 %v4504_v17 }
 0x297   : > { %4030 = vmatpush3.bf16.msra.mxu1 %v4505_v41  ;;  %4195 = vmatprep.subr.bf16.mxu0 %v5648_v31 }
 0x298   : > { %4095 = vmatprep.subr.bf16.mxu1 %v4507_v23 }
 0x328   : > { %v3979_v54 = vpop.f32.mrf.mxu1 }
 0x32a   : > { %v3980_v6 = vpop.f32.mrf.mxu1 }
 0x32b   : > { %v3981_v56 = vadd.f32 %v3980_v6, %v3979_v54 }
 0x32c   : > { %v3982_v61 = vpop.f32.mrf.mxu1 }
 0x32d   : > { %v2352_v7 = vadd.f32 %v3981_v56, %v5654_v57 }
 0x32e   : > { %v3983_v22 = vpop.f32.mrf.mxu1 }
 0x32f   : > { %v3984_v20 = vadd.f32 %v3983_v22, %v3982_v61 }
 0x330   : > { %v3985_v30 = vpop.f32.mrf.mxu1 }
 0x331   : > { %v4189_v40 = vpop.f32.mrf.mxu0  ;;  %v2355_v38 = vadd.f32 %v3984_v20, %v5654_v57 }
 0x332   : > { %v3986_v2 = vpop.f32.mrf.mxu1 }
 0x333   : > { %v2416_v51 = vpop.f32.mrf.mxu0  ;;  %v3987_v35 = vadd.f32 %v3986_v2, %v3985_v30 }
 0x334   : > { %v3988_v12 = vpop.f32.mrf.mxu1  ;;  %v5658_v11 = vadd.f32 %v2416_v51, %v2352_v7 }
 0x335   : > { %v4190_v15 = vpop.f32.mrf.mxu0  ;;  %v2360_v55 = vadd.f32 %v3987_v35, %v5654_v57  ;;  %v5716_v35 = vld [vmem:[#allocation8 + $0x1b0] sm:$0xff]  }
 0x336   : > { %v3989_v13 = vpop.f32.mrf.mxu1  ;;  %v2475_v32 = vrot.slane %v5658_v11, 6  ;;  %v2503_v5 = vrot.slane %v5658_v11, 7  ;;  %v2447_v54 = vrot.slane %v5658_v11, 5 }
 0x337   : > { %v2419_v58 = vpop.f32.mrf.mxu0  ;;  %v3990_v37 = vadd.f32 %v3989_v13, %v3988_v12  ;;  %v5668_v18 = vadd.f32 %v4189_v40, %v2360_v55 }
 0x338   : > { %v5660_v62 = vadd.f32 %v2419_v58, %v2355_v38  ;;  %v3991_v25 = vpop.f32.mrf.mxu1 }
 0x339   : > { %v2363_v3 = vadd.f32 %v3990_v37, %v5654_v57  ;;  %v2477_v9 = vrot.slane %v5668_v18, 6 }
 0x33a   : > { %v3992_v24 = vpop.f32.mrf.mxu1  ;;  %v2531_v46 = vpack.c.bf16 %v5660_v62, %v5658_v11  ;;  %v2476_v48 = vrot.slane %v5660_v62, 6  ;;  %v2504_v1 = vrot.slane %v5660_v62, 7  ;;  %v2448_v16 = vrot.slane %v5660_v62, 5 }
 0x33b   : > { %v5670_v42 = vadd.f32 %v4190_v15, %v2363_v3  ;;  %v3993_v8 = vadd.f32 %v3992_v24, %v3991_v25  ;;  %v4510_v3 = vld [vmem:[#allocation8 + $0x170] sm:$0xff]  }
 0x33c   : > { %v3994_v44 = vpop.f32.mrf.mxu1  ;;  %3164 = vmatprep.mubr.bf16.mxu0 %v2531_v46  ;;  %v2489_v41 = vsel %vm6243_vm7, %v2475_v32, %v2476_v48  ;;  %v2517_v23 = vsel %vm6244_vm1, %v2503_v5, %v2504_v1  ;;  %v2461_v56 = vsel %vm6245_vm14, %v2447_v54, %v2448_v16  ;;  %v2488_v2 = vsel %vm6247_vm11, %v2476_v48, %v2477_v9  ;;  %vm6249_vm7 = vmmov %vm6244_vm1 }
 0x33d   : > { %v2478_v10 = vrot.slane %v5670_v42, 6  ;;  %v2368_v40 = vadd.f32 %v3993_v8, %v5654_v57  ;;  %vm6250_vm1 = vmmov %vm6245_vm14  ;;  %v2532_v25 = vpack.c.bf16 %v5670_v42, %v5668_v18  ;;  %v2506_v37 = vrot.slane %v5670_v42, 7  ;;  %v4514_v8 = vld [vmem:[#allocation8 + $0x128] sm:$0xff]  }
 0x33e   : > { %v3995_v0 = vpop.f32.mrf.mxu1  ;;  %vm6255_vm14 = vmmov %vm6246_vm6  ;;  %vm6256_vm11 = vnez %v6156_v19 }
 0x33f   : > { %v3996_v45 = vadd.f32 %v3995_v0, %v3994_v44  ;;  %v2487_v20 = vsel %vm6246_vm6, %v2477_v9, %v2478_v10  ;;  %v4508_v44 = vld [vmem:[#allocation8 + $0x138] sm:$0xff]   ;;  %v2450_v0 = vrot.slane %v5670_v42, 5 }
 0x340   : > { %v3997_v39 = vpop.f32.mrf.mxu1  ;;  %v3755_v55 = vpack.c.bf16 %v2487_v20, %v2488_v2 }
 0x341   : > { %v5664_v60 = vpop.f32.mrf.mxu0  ;;  %v2371_v6 = vadd.f32 %v3996_v45, %v5654_v57 }
 0x342   : > { %v3998_v52 = vpop.f32.mrf.mxu1 }
 0x343   : > { %v2432_v36 = vpop.f32.mrf.mxu0  ;;  %v3999_v24 = vadd.f32 %v3998_v52, %v3997_v39  ;;  %v2505_v39 = vrot.slane %v5668_v18, 7  ;;  %v2449_v52 = vrot.slane %v5668_v18, 5 }
 0x344   : > { %v4000_v29 = vpop.f32.mrf.mxu1  ;;  %v5714_v46 = vadd.f32 %v2432_v36, %v2368_v40 }
 0x345   : > { %v4194_v43 = vpop.f32.mrf.mxu0  ;;  %v2376_v47 = vadd.f32 %v3999_v24, %v5654_v57  ;;  %v2592_v24 = vrot.slane %v5660_v62, 3 }
 0x346   : > { %v4001_v28 = vpop.f32.mrf.mxu1 }
 0x347   : > { %v4002_v49 = vadd.f32 %v4001_v28, %v4000_v29  ;;  %v2435_v17 = vpop.f32.mrf.mxu0  ;;  %v5736_v29 = vld [vmem:[#allocation8 + $0x1a8] sm:$0xff]  }
 0x348   : > { %v5698_v51 = vadd.f32 %v2435_v17, %v2371_v6  ;;  %v4516_v17 = vld [vmem:[#allocation8 + $0x160] sm:$0xff]   ;;  %v5772_v6 = vld [vmem:[#allocation8 + $0x198] sm:$0xff]  }
 0x349   : > { %v2379_v34 = vadd.f32 %v4002_v49, %v5654_v57  ;;  %v2479_v49 = vrot.slane %v5714_v46, 6 }
 0x34a   : > { %v2480_v36 = vrot.slane %v5698_v51, 6  ;;  %v2508_v9 = vrot.slane %v5698_v51, 7 }
 0x34b   : > { %v5680_v26 = vadd.f32 %v4194_v43, %v2379_v34  ;;  %v4513_v43 = vld [vmem:[#allocation8 + $0x168] sm:$0xff]  }
 0x34c   : > { %v2485_v48 = vsel %vm6255_vm14, %v2479_v49, %v2480_v36  ;;  %vm6265_vm14 = vnez %v6162_v63  ;;  %v4523_v63 = vld [vmem:[#allocation8 + $0x110] sm:$0xff]  }
 0x34d   : > { %v2482_v61 = vrot.slane %v5680_v26, 6  ;;  %v2510_v22 = vrot.slane %v5680_v26, 7  ;;  %v2454_v30 = vrot.slane %v5680_v26, 5 }
 0x34f   : > { %v2490_v12 = vsel %vm6248_vm15, %v2482_v61, %v2475_v32  ;;  %v2518_v15 = vsel %vm6249_vm7, %v2510_v22, %v2503_v5  ;;  %v2462_v7 = vsel %vm6250_vm1, %v2454_v30, %v2447_v54  ;;  %v5749_v32 = vadd.f32 %v5664_v60, %v2376_v47  ;;  %v4525_v47 = vld [vmem:[#allocation8 + $0x148] sm:$0xff]  }
 0x350   : > { %v3749_v13 = vpack.c.bf16 %v2489_v41, %v2490_v12  ;;  %v3773_v38 = vpack.c.bf16 %v2517_v23, %v2518_v15  ;;  %v3752_v58 = vpack.c.bf16 %v2461_v56, %v2462_v7  ;;  %v2533_v5 = vpack.c.bf16 %v5698_v51, %v5714_v46  ;;  %v4519_v56 = vld [vmem:[#allocation8 + $0x158] sm:$0xff]  }
 0x351   : > { %v2452_v41 = vrot.slane %v5698_v51, 5  ;;  %v2507_v23 = vrot.slane %v5714_v46, 7  ;;  %vm6257_vm15 = vnez %v6160_v50  ;;  %v2481_v19 = vrot.slane %v5749_v32, 6 }
 0x352   : > { %3750 = vmatprep.mubr.msk.bf16.mxu1 %vm4972_vm8, %v3749_v13  ;;  %3774 = vmatmul.mubr.msk.bf16.vlgmr.msra.gmra.mxu0 %vm4998_vm10, %v3773_v38  ;;  %vm6251_vm8 = vmmov %vm6249_vm7  ;;  %v2534_v7 = vpack.c.bf16 %v5680_v26, %v5749_v32  ;;  %v4520_v38 = vld [vmem:[#allocation8 + $0x118] sm:$0xff]  }
 0x353   : > { %3753 = vmatmul.mubr.msk.bf16.vlgmr.msra.gmra.mxu1 %vm4983_vm9, %v3752_v58  ;;  %3172 = vmatprep.mubr.bf16.mxu0 %v2532_v25  ;;  %v2515_v53 = vsel %vm6251_vm8, %v2505_v39, %v2506_v37  ;;  %vm6252_vm9 = vmmov %vm6250_vm1  ;;  %v5791_v58 = vld [vmem:[#allocation8 + $0x190] sm:$0xff]  }
 0x354   : > { %4196 = vmatpush3.bf16.msra.mxu0 %v5648_v31  ;;  %3756 = vmatprep.mubr.msk.bf16.mxu1 %vm5040_vm3, %v3755_v55  ;;  %v2459_v28 = vsel %vm6252_vm9, %v2449_v52, %v2450_v0  ;;  %vm6253_vm10 = vmmov %vm6249_vm7  ;;  %v4522_v25 = vld [vmem:[#allocation8 + $0x150] sm:$0xff]   ;;  %v2565_v55 = vrot.slane %v5668_v18, 2 }
 0x355   : > { %4096 = vmatpush3.bf16.msra.mxu1 %v4508_v44  ;;  %4197 = vmatprep.subr.bf16.mxu0 %v5716_v35  ;;  %v2516_v14 = vsel %vm6253_vm10, %v2504_v1, %v2505_v39  ;;  %vm6254_vm3 = vmmov %vm6250_vm1  ;;  %v2486_v1 = vsel %vm6246_vm6, %v2478_v10, %v2479_v49  ;;  %v2451_v10 = vrot.slane %v5714_v46, 5  ;;  %v2593_v44 = vrot.slane %v5668_v18, 3 }
 0x356   : > { %4097 = vmatprep.subr.bf16.mxu1 %v4510_v3  ;;  %v2460_v57 = vsel %vm6254_vm3, %v2448_v16, %v2449_v52  ;;  %v3776_v45 = vpack.c.bf16 %v2515_v53, %v2516_v14  ;;  %v5756_v16 = vld [vmem:[#allocation8 + $0x1a0] sm:$0xff]   ;;  %v3761_v60 = vpack.c.bf16 %v2485_v48, %v2486_v1  ;;  %vm6261_vm8 = vmmov %vm6246_vm6  ;;  %v2591_v3 = vrot.slane %v5658_v11, 3  ;;  %v5812_v52 = vld [vmem:[#allocation8 + $0x188] sm:$0xff]  }
 0x357   : > { %v3758_v34 = vpack.c.bf16 %v2459_v28, %v2460_v57  ;;  %v2483_v20 = vsel %vm6261_vm8, %v2481_v19, %v2482_v61  ;;  %vm6262_vm9 = vmmov %vm6254_vm3  ;;  %vm6264_vm3 = vnez %v6164_v4  ;;  %v2453_v4 = vrot.slane %v5749_v32, 5  ;;  %v4526_v48 = vld [vmem:[#allocation8 + $0x108] sm:$0xff]   ;;  %v4528_v1 = vld [vmem:[#allocation8 + $0x140] sm:$0xff]  }
 0x358   : > { %4198 = vmatpush3.bf16.msra.mxu0 %v5716_v35  ;;  %v2458_v12 = vsel %vm6262_vm9, %v2450_v0, %v2451_v10  ;;  %vm6263_vm10 = vmmov %vm6246_vm6  ;;  %v2564_v0 = vrot.slane %v5660_v62, 2  ;;  %vm6266_vm6 = vnez %v6168_v33  ;;  %vm6271_vm8 = vcmp.lt.s32.totalorder %v4939_v21, 6 }
 0x359   : > { %4098 = vmatpush3.bf16.msra.mxu1 %v4511_v59  ;;  %4199 = vmatprep.subr.bf16.mxu0 %v5736_v29  ;;  %v2484_v13 = vsel %vm6263_vm10, %v2480_v36, %v2481_v19  ;;  %v2563_v36 = vrot.slane %v5658_v11, 2  ;;  %vm6272_vm9 = vmmov %vm6271_vm8  ;;  %v2535_v19 = vrot.slane %v5658_v11, 1 }
 0x35a   : > { %3777 = vmatmul.mubr.msk.bf16.gmra.mxu0 %vm5068_vm5, %v3776_v45  ;;  %4099 = vmatprep.subr.bf16.mxu1 %v4513_v43  ;;  %vm6258_vm5 = vmmov %vm6249_vm7  ;;  %v3767_v61 = vpack.c.bf16 %v2483_v20, %v2484_v13  ;;  %v2576_v28 = vsel %vm6271_vm8, %v2564_v0, %v2565_v55  ;;  %v5837_v45 = vld [vmem:[#allocation8 + $0x180] sm:$0xff]  }
 0x35b   : > { %3759 = vmatmul.mubr.msk.bf16.gmra.mxu1 %vm6256_vm11, %v3758_v34  ;;  %3180 = vmatprep.mubr.bf16.mxu0 %v2533_v5  ;;  %v2513_v54 = vsel %vm6258_vm5, %v2507_v23, %v2508_v9  ;;  %vm6259_vm7 = vmmov %vm6250_vm1  ;;  %v6274_v34 = vld [vmem:[#allocation16_spill] sm:$0xff] }
 0x35c   : > { %4200 = vmatpush3.bf16.msra.mxu0 %v5736_v29  ;;  %3762 = vmatprep.mubr.msk.bf16.mxu1 %vm6257_vm15, %v3761_v60  ;;  %v2457_v40 = vsel %vm6259_vm7, %v2451_v10, %v2452_v41  ;;  %vm6260_vm1 = vmmov %vm6258_vm5  ;;  %vm6269_vm5 = vcmp.lt.s32.totalorder %v4939_v21, 5  ;;  %v6278_v60 = vld [vmem:[#allocation18_spill] sm:$0xff]  ;;  %v6280_v10 = vld [vmem:[#allocation17_spill] sm:$0xff] }
 0x35d   : > { %4100 = vmatpush3.bf16.msra.mxu1 %v4514_v8  ;;  %4201 = vmatprep.subr.bf16.mxu0 %v5756_v16  ;;  %v2514_v50 = vsel %vm6260_vm1, %v2506_v37, %v2507_v23  ;;  %v3764_v15 = vpack.c.bf16 %v2457_v40, %v2458_v12  ;;  %v2509_v37 = vrot.slane %v5749_v32, 7  ;;  %vm6267_vm11 = vmmov %vm6260_vm1  ;;  %v2604_v59 = vsel %vm6269_vm5, %v2592_v24, %v2593_v44 }
 0x35e   : > { %4101 = vmatprep.subr.bf16.mxu1 %v4516_v17  ;;  %v3779_v2 = vpack.c.bf16 %v2513_v54, %v2514_v50  ;;  %vm6268_vm15 = vmmov %vm6259_vm7  ;;  %v2595_v8 = vrot.slane %v5714_v46, 3  ;;  %v2536_v17 = vrot.slane %v5660_v62, 1  ;;  %v2594_v23 = vrot.slane %v5670_v42, 3  ;;  %v4529_v54 = vld [vmem:[#allocation8 + $0x100] sm:$0xff]  }
 0x35f   : > { %v2511_v39 = vsel %vm6267_vm11, %v2509_v37, %v2510_v22  ;;  %v2455_v33 = vsel %vm6268_vm15, %v2453_v4, %v2454_v30  ;;  %vm6270_vm7 = vmmov %vm6269_vm5  ;;  %v2512_v22 = vsel %vm6260_vm1, %v2508_v9, %v2509_v37  ;;  %v2577_v30 = vsel %vm6272_vm9, %v2563_v36, %v2564_v0  ;;  %v6276_v9 = vld [vmem:[#allocation15_spill] sm:$0xff] }
 0x360   : > { %4202 = vmatpush3.bf16.msra.mxu0 %v5756_v16  ;;  %v2605_v53 = vsel %vm6270_vm7, %v2591_v3, %v2592_v24  ;;  %v3782_v49 = vpack.c.bf16 %v2511_v39, %v2512_v22  ;;  %vm6273_vm10 = vmmov %vm6268_vm15  ;;  %v3785_v5 = vpack.c.bf16 %v2576_v28, %v2577_v30  ;;  %vm6281_vm11 = vnez %v6280_v10 }
 0x361   : > { %4102 = vmatpush3.bf16.msra.mxu1 %v4517_v27  ;;  %4203 = vmatprep.subr.bf16.mxu0 %v5772_v6  ;;  %v2456_v43 = vsel %vm6273_vm10, %v2452_v41, %v2453_v4  ;;  %v3809_v57 = vpack.c.bf16 %v2604_v59, %v2605_v53  ;;  %v2537_v41 = vrot.slane %v5668_v18, 1  ;;  %v2567_v27 = vrot.slane %v5714_v46, 2  ;;  %vm6282_vm15 = vmmov %vm6269_vm5 }
 0x362   : > { %3780 = vmatmul.mubr.msk.bf16.gmra.mxu0 %vm6264_vm3, %v3779_v2  ;;  %4103 = vmatprep.subr.bf16.mxu1 %v4519_v56  ;;  %v3770_v14 = vpack.c.bf16 %v2455_v33, %v2456_v43  ;;  %vm6275_vm3 = vnez %v6274_v34  ;;  %v2602_v62 = vsel %vm6282_vm15, %v2594_v23, %v2595_v8  ;;  %v2566_v18 = vrot.slane %v5670_v42, 2  ;;  %vm6285_vm1 = vmmov %vm6282_vm15 }
 0x363   : > { %3765 = vmatmul.mubr.msk.bf16.gmra.mxu1 %vm6265_vm14, %v3764_v15  ;;  %3188 = vmatprep.mubr.bf16.mxu0 %v2534_v7  ;;  %vm6277_vm14 = vnez %v6276_v9  ;;  %vm6283_vm5 = vcmp.lt.s32.totalorder %v4939_v21, 7  ;;  %v2603_v50 = vsel %vm6285_vm1, %v2593_v44, %v2594_v23  ;;  %vm6286_vm9 = vmmov %vm6271_vm8  ;;  %v6287_v7 = vld [vmem:[#allocation20_spill] sm:$0xff]  ;;  %v2569_v24 = vrot.slane %v5749_v32, 2  ;;  %v6291_v44 = vld [vmem:[#allocation21_spill] sm:$0xff] }
 0x364   : > { %4204 = vmatpush3.bf16.msra.mxu0 %v5772_v6  ;;  %3768 = vmatprep.mubr.msk.bf16.mxu1 %vm6266_vm6, %v3767_v61  ;;  %vm6279_vm6 = vnez %v6278_v60  ;;  %v2548_v40 = vsel %vm6283_vm5, %v2536_v17, %v2537_v41  ;;  %vm6284_vm7 = vmmov %vm6283_vm5  ;;  %v2574_v20 = vsel %vm6271_vm8, %v2566_v18, %v2567_v27  ;;  %v3812_v2 = vpack.c.bf16 %v2602_v62, %v2603_v50  ;;  %v6289_v61 = vld [vmem:[#allocation19_spill] sm:$0xff]  ;;  %v6308_v60 = vld [vmem:[#allocation22_spill] sm:$0xff] }
 0x365   : > { %4104 = vmatpush3.bf16.msra.mxu1 %v4520_v38  ;;  %4205 = vmatprep.subr.bf16.mxu0 %v5791_v58  ;;  %v2549_v56 = vsel %vm6284_vm7, %v2535_v19, %v2536_v17  ;;  %v2575_v15 = vsel %vm6286_vm9, %v2565_v55, %v2566_v18  ;;  %vm6288_vm10 = vnez %v6287_v7  ;;  %v2539_v38 = vrot.slane %v5714_v46, 1  ;;  %vm6295_vm15 = vmmov %vm6271_vm8 }
 0x366   : > { %4105 = vmatprep.subr.bf16.mxu1 %v4522_v25  ;;  %v3788_v12 = vpack.c.bf16 %v2548_v40, %v2549_v56  ;;  %v3791_v13 = vpack.c.bf16 %v2574_v20, %v2575_v15  ;;  %v2568_v25 = vrot.slane %v5698_v51, 2  ;;  %v2538_v37 = vrot.slane %v5670_v42, 1  ;;  %vm6298_vm7 = vmmov %vm6283_vm5 }
 0x367   : > { %v2540_v42 = vrot.slane %v5698_v51, 1  ;;  %v2541_v33 = vrot.slane %v5749_v32, 1  ;;  %v2570_v59 = vrot.slane %v5680_v26, 2  ;;  %vm6299_vm1 = vmmov %vm6283_vm5  ;;  %v2542_v43 = vrot.slane %v5680_v26, 1 }
 0x368   : > { %4206 = vmatpush3.bf16.msra.mxu0 %v5791_v58  ;;  %v2573_v4 = vsel %vm6295_vm15, %v2567_v27, %v2568_v25  ;;  %vm6304_vm9 = vmmov %vm6299_vm1 }
 0x369   : > { %4106 = vmatpush3.bf16.msra.mxu1 %v4523_v63  ;;  %4207 = vmatprep.subr.bf16.mxu0 %v5812_v52  ;;  %v2547_v63 = vsel %vm6283_vm5, %v2537_v41, %v2538_v37  ;;  %v2545_v22 = vsel %vm6299_vm1, %v2539_v38, %v2540_v42  ;;  %v2571_v28 = vsel %vm6271_vm8, %v2569_v24, %v2570_v59 }
 0x36a   : > { %3783 = vmatmul.mubr.msk.bf16.gmra.mxu0 %vm6275_vm3, %v3782_v49  ;;  %4107 = vmatprep.subr.bf16.mxu1 %v4525_v47  ;;  %vm6290_vm3 = vnez %v6289_v61 }
 0x36b   : > { %3771 = vmatmul.mubr.msk.bf16.gmra.mxu1 %vm6277_vm14, %v3770_v14  ;;  %4211 = vmatprep.mubr.msk.bf16.mxu0 %vm6279_vm6, %v3809_v57  ;;  %vm6292_vm14 = vnez %v6291_v44  ;;  %vm6293_vm6 = vmmov %vm6283_vm5  ;;  %v2596_v57 = vrot.slane %v5698_v51, 3 }
 0x36c   : > { %4208 = vmatpush3.bf16.msra.mxu0 %v5812_v52  ;;  %3786 = vmatprep.mubr.msk.bf16.mxu1 %vm6281_vm11, %v3785_v5  ;;  %v2546_v0 = vsel %vm6293_vm6, %v2538_v37, %v2539_v38  ;;  %vm6294_vm11 = vmmov %vm6271_vm8 }
 0x36d   : > { %4108 = vmatpush3.bf16.msra.mxu1 %v4526_v48  ;;  %4209 = vmatprep.subr.bf16.mxu0 %v5837_v45  ;;  %v2572_v55 = vsel %vm6294_vm11, %v2568_v25, %v2569_v24  ;;  %v3794_v39 = vpack.c.bf16 %v2546_v0, %v2547_v63  ;;  %v2597_v48 = vrot.slane %v5749_v32, 3 }
 0x36e   : > { %4109 = vmatprep.subr.bf16.mxu1 %v4528_v1 }
 0x370   : > { %4210 = vmatpush3.bf16.msra.mxu0 %v5837_v45 }
 0x371   : > { %4110 = vmatpush3.bf16.msra.mxu1 %v4529_v54 }
 0x372   : > { %4219 = vmatprep.subr.bf16.mxu1 %v5648_v31 }
 0x373   : > { %4212 = vmatmul.mubr.msk.bf16.vlgmr.msra.gmra.mxu0 %vm6288_vm10, %v3812_v2  ;;  %vm6305_vm10 = vcmp.lt.s32.totalorder %v4939_v21, 5 }
 0x374   : > { %3789 = vmatmul.mubr.msk.bf16.vlgmr.msra.gmra.mxu1 %vm6290_vm3, %v3788_v12  ;;  %v2600_v5 = vsel %vm6305_vm10, %v2596_v57, %v2597_v48 }
 0x375   : > { %3792 = vmatprep.mubr.msk.bf16.mxu1 %vm6292_vm14, %v3791_v13  ;;  %4227 = vmatpush3.bf16.msra.mxu1 %v5648_v31  ;;  %v3797_v31 = vpack.c.bf16 %v2572_v55, %v2573_v4 }
 0x376   : > { %4220 = vmatprep.subr.bf16.mxu1 %v5716_v35 }
 0x379   : > { %4228 = vmatpush3.bf16.msra.mxu1 %v5716_v35  ;;  %v2544_v35 = vsel %vm6298_vm7, %v2540_v42, %v2541_v33 }
 0x37a   : > { %4221 = vmatprep.subr.bf16.mxu1 %v5736_v29  ;;  %v3800_v49 = vpack.c.bf16 %v2544_v35, %v2545_v22 }
 0x37c   : > { %3795 = vmatmul.mubr.msk.bf16.gmra.mxu1 %vm5340_vm4, %v3794_v39  ;;  %vm6300_vm4 = vmmov %vm6271_vm8 }
 0x37d   : > { %3798 = vmatprep.mubr.msk.bf16.mxu1 %vm5353_vm13, %v3797_v31  ;;  %4229 = vmatpush3.bf16.msra.mxu1 %v5736_v29  ;;  %v2578_v30 = vsel %vm6300_vm4, %v2570_v59, %v2563_v36  ;;  %vm6303_vm13 = vmmov %vm6299_vm1  ;;  %v2550_v36 = vsel %vm6304_vm9, %v2542_v43, %v2535_v19 }
 0x37e   : > { %4222 = vmatprep.subr.bf16.mxu1 %v5756_v16  ;;  %v3803_v29 = vpack.c.bf16 %v2578_v30, %v2571_v28 }
 0x381   : > { %4230 = vmatpush3.bf16.msra.mxu1 %v5756_v16  ;;  %v2543_v16 = vsel %vm6303_vm13, %v2541_v33, %v2542_v43 }
 0x382   : > { %4223 = vmatprep.subr.bf16.mxu1 %v5772_v6  ;;  %v3806_v32 = vpack.c.bf16 %v2550_v36, %v2543_v16  ;;  %v5987_v16 = vld [vmem:[%s6090_s7] ss:$0 sm:$0xff] }
 0x384   : > { %3801 = vmatmul.mubr.msk.bf16.gmra.mxu1 %vm5371_vm0, %v3800_v49  ;;  %vm6306_vm0 = vmmov %vm6305_vm10 }
 0x385   : > { %3804 = vmatprep.mubr.msk.bf16.mxu1 %vm5377_vm12, %v3803_v29  ;;  %4231 = vmatpush3.bf16.msra.mxu1 %v5772_v6  ;;  %v2601_v51 = vsel %vm6306_vm0, %v2595_v8, %v2596_v57  ;;  %v2598_v6 = vrot.slane %v5680_v26, 3  ;;  %vm6309_vm12 = vnez %v6308_v60  ;;  %vm6310_vm3 = vmmov %vm6306_vm0  ;;  %v6312_v8 = vld [vmem:[#allocation25_spill] sm:$0xff] }
 0x386   : > { %4224 = vmatprep.subr.bf16.mxu1 %v5791_v58  ;;  %v3815_v1 = vpack.c.bf16 %v2600_v5, %v2601_v51  ;;  %vm6311_vm14 = vmmov %vm6306_vm0  ;;  %v4530_v5 = vld [vmem:[%s4925_s18] sm:$0xff] }
 0x387   : > { %v2606_v46 = vsel %vm6310_vm3, %v2598_v6, %v2591_v3 }
 0x389   : > { %4232 = vmatpush3.bf16.msra.mxu1 %v5791_v58  ;;  %v2599_v58 = vsel %vm6311_vm14, %v2597_v48, %v2598_v6 }
 0x38a   : > { %4225 = vmatprep.subr.bf16.mxu1 %v5812_v52  ;;  %v3818_v26 = vpack.c.bf16 %v2606_v46, %v2599_v58 }
 0x38c   : > { %3807 = vmatmul.mubr.msk.bf16.gmra.mxu1 %vm5399_vm2, %v3806_v32  ;;  %vm6313_vm2 = vnez %v6312_v8 }
 0x38d   : > { %4233 = vmatpush3.bf16.msra.mxu1 %v5812_v52  ;;  %4215 = vmatprep.mubr.msk.bf16.mxu1 %vm6309_vm12, %v3815_v1 }
 0x38e   : > { %4226 = vmatprep.subr.bf16.mxu1 %v5837_v45 }
 0x391   : > { %4234 = vmatpush3.bf16.msra.mxu1 %v5837_v45 }
 0x394   : > { %4216 = vmatmul.mubr.msk.bf16.vlgmr.msra.gmra.mxu1 %vm6313_vm2, %v3818_v26 }
 0x412   : > { %v4071_v52 = vpop.f32.mrf.mxu0 }
 0x413   : > { %v4031_v17 = vpop.f32.mrf.mxu1 }
 0x414   : > { %v4072_v41 = vpop.f32.mrf.mxu0 }
 0x415   : > { %v4032_v23 = vpop.f32.mrf.mxu1  ;;  %v4073_v63 = vadd.f32 %v4072_v41, %v4071_v52 }
 0x416   : > { %v4074_v10 = vpop.f32.mrf.mxu0  ;;  %v4033_v39 = vadd.f32 %v4032_v23, %v4031_v17  ;;  %v4531_v17 = vld [vmem:[%s4925_s18 + $0x8] sm:$0xff] }
 0x417   : > { %v4034_v27 = vpop.f32.mrf.mxu1 }
 0x418   : > { %v4075_v54 = vpop.f32.mrf.mxu0  ;;  %v3167_v59 = vadd.f32 %v4073_v63, %v4033_v39  ;;  %v4533_v39 = vld [vmem:[%s4925_s18 + $0x18] sm:$0xff] }
 0x419   : > { %v4035_v11 = vpop.f32.mrf.mxu1  ;;  %v4076_v53 = vadd.f32 %v4075_v54, %v4074_v10 }
 0x41a   : > { %v4077_v19 = vpop.f32.mrf.mxu0  ;;  %v4036_v35 = vadd.f32 %v4035_v11, %v4034_v27 }
 0x41b   : > { %v4037_v62 = vpop.f32.mrf.mxu1 }
 0x41c   : > { %v4078_v3 = vpop.f32.mrf.mxu0  ;;  %v3170_v57 = vadd.f32 %v4076_v53, %v4036_v35 }
 0x41d   : > { %v4038_v18 = vpop.f32.mrf.mxu1  ;;  %v4079_v49 = vadd.f32 %v4078_v3, %v4077_v19  ;;  %v4532_v3 = vld [vmem:[%s4925_s18 + $0x10] sm:$0xff] }
 0x41e   : > { %v4080_v21 = vpop.f32.mrf.mxu0  ;;  %v4039_v29 = vadd.f32 %v4038_v18, %v4037_v62 }
 0x41f   : > { %v4040_v40 = vpop.f32.mrf.mxu1 }
 0x420   : > { %v4081_v56 = vpop.f32.mrf.mxu0  ;;  %v3175_v6 = vadd.f32 %v4079_v49, %v4039_v29 }
 0x421   : > { %v4041_v45 = vpop.f32.mrf.mxu1  ;;  %v4082_v1 = vadd.f32 %v4081_v56, %v4080_v21 }
 0x422   : > { %v5952_v50 = vpop.f32.mrf.mxu0  ;;  %v4042_v46 = vadd.f32 %v4041_v45, %v4040_v40 }
 0x423   : > { %v5954_v20 = vpop.f32.mrf.mxu1 }
 0x424   : > { %v5956_v2 = vpop.f32.mrf.mxu0  ;;  %v3178_v27 = vadd.f32 %v4082_v1, %v4042_v46 }
 0x425   : > { %v5958_v12 = vpop.f32.mrf.mxu1  ;;  %v4085_v35 = vadd.f32 %v5956_v2, %v5952_v50 }
 0x426   : > { %v5960_v15 = vpop.f32.mrf.mxu0 }
 0x427   : > { %v5962_v7 = vpop.f32.mrf.mxu1 }
 0x428   : > { %v5964_v13 = vpop.f32.mrf.mxu0 }
 0x429   : > { %v5966_v38 = vpop.f32.mrf.mxu1  ;;  %v4088_v50 = vadd.f32 %v5964_v13, %v5960_v15 }
 0x42a   : > { %v5968_v61 = vpop.f32.mrf.mxu0 }
 0x42b   : > { %v5970_v25 = vpop.f32.mrf.mxu1 }
 0x42c   : > { %v5972_v24 = vpop.f32.mrf.mxu0 }
 0x42d   : > { %v5974_v44 = vpop.f32.mrf.mxu1 }
 0x42e   : > { %v5976_v37 = vpop.f32.mrf.mxu0  ;;  %v4051_v53 = vadd.f32 %v5974_v44, %v5970_v25 }
 0x42f   : > { %v5978_v0 = vpop.f32.mrf.mxu1 }
 0x430   : > { %v5980_v55 = vpop.f32.mrf.mxu0 }
 0x431   : > { %v5982_v4 = vpop.f32.mrf.mxu1 }
 0x433   : > { %v4213_v31 = vpop.f32.mrf.mxu0 }
 0x434   : > { %v4111_v42 = vpop.f32.mrf.mxu1 }
 0x435   : > { %v3296_v33 = vpop.f32.mrf.mxu0 }
 0x436   : > { %v4112_v47 = vpop.f32.mrf.mxu1 }
 0x437   : > { %v4113_v22 = vadd.f32 %v4112_v47, %v4111_v42  ;;  %v4214_v43 = vpop.f32.mrf.mxu0 }
 0x438   : > { %v4114_v28 = vpop.f32.mrf.mxu1 }
 0x439   : > { %v3232_v30 = vadd.f32 %v4113_v22, %v3167_v59  ;;  %v3299_v9 = vpop.f32.mrf.mxu0  ;;  %v4045_v22 = vadd.f32 %v5958_v12, %v5954_v20  ;;  %v4048_v20 = vadd.f32 %v5966_v38, %v5962_v7 }
 0x43a   : > { %v4115_v14 = vpop.f32.mrf.mxu1 }
 0x43b   : > { %v3297_v48 = vadd.f32 %v3296_v33, %v3232_v30  ;;  %v4116_v34 = vadd.f32 %v4115_v14, %v4114_v28  ;;  %v3183_v25 = vadd.f32 %v4085_v35, %v4045_v22 }
 0x43c   : > { %v4117_v36 = vpop.f32.mrf.mxu1 }
 0x43d   : > { %v3327_v51 = vadd.f32 %v4530_v5, %v3297_v48  ;;  %v3235_v32 = vadd.f32 %v4116_v34, %v3170_v57  ;;  %v4534_v34 = vld [vmem:[%s4925_s18 + $0x30] sm:$0xff]  ;;  %v4535_v5 = vld [vmem:[%s4925_s18 + $0x20] sm:$0xff] }
 0x43e   : > { %v4118_v60 = vpop.f32.mrf.mxu1 }
 0x43f   : > { %v3342_v58 = vadd.f32 %v5987_v16, %v3327_v51  ;;  %v3300_v26 = vadd.f32 %v3299_v9, %v3235_v32  ;;  %v4119_v8 = vadd.f32 %v4118_v60, %v4117_v36  ;;  %v4536_v60 = vld [vmem:[%s4925_s18 + $0x38] sm:$0xff] }
 0x440   : > { %v4120_v52 = vpop.f32.mrf.mxu1 }
 0x441   : > { %3350 = vst [vmem:[%s5993_s21] sm:$0xff] %v3342_v58  ;;  %v3328_v41 = vadd.f32 %v4531_v17, %v3300_v26  ;;  %v3240_v23 = vadd.f32 %v4119_v8, %v3175_v6  ;;  %v4537_v8 = vld [vmem:[%s4925_s18 + $0x28] sm:$0xff]  ;;  %s4730_s18 = smov [#allocation10]  }
 0x442   : > { %v4121_v10 = vpop.f32.mrf.mxu1  ;;  %s4648_s11 = sshll.u32 %s4730_s18, 4  ;;  %s4649_s11 = int_to_ptr.vmem [resolvable:$false] %s4648_s11 }
 0x443   : > { %v3343_v54 = vadd.f32 %v5987_v16, %v3328_v41  ;;  %v3305_v11 = vadd.f32 %v4213_v31, %v3240_v23  ;;  %v4122_v19 = vadd.f32 %v4121_v10, %v4120_v52  ;;  %v4091_v31 = vadd.f32 %v5972_v24, %v5968_v61  ;;  %s4650_s13 = scalar_lea.vmem %s4649_s11, 2048  ;;  %p4651_p5 = scmp.lt.s32.totalorder %s6037_s10, %s4649_s11 }
 0x444   : > { %v4123_v62 = vpop.f32.mrf.mxu1  ;;  %v4054_v61 = vadd.f32 %v5982_v4, %v5978_v0  ;;  %v3186_v4 = vadd.f32 %v4088_v50, %v4048_v20  ;;  %p4652_p10 = scmp.lt.s32.totalorder %s4650_s13, %s4644_s15 }
 0x445   : > { %3351 = vst [vmem:[%s5993_s21 + $0x8] sm:$0xff] %v3343_v54  ;;  %v3329_v18 = vadd.f32 %v4532_v3, %v3305_v11  ;;  %v3243_v21 = vadd.f32 %v4122_v19, %v3178_v27  ;;  %v3191_v29 = vadd.f32 %v4091_v31, %v4051_v53 }
 0x446   : > { %v4124_v40 = vpop.f32.mrf.mxu1  ;;  %p4653_p2 = por %p4652_p10, %p4651_p5 }
 0x447   : > { %v3344_v56 = vadd.f32 %v5987_v16, %v3329_v18  ;;  %v3308_v45 = vadd.f32 %v4214_v43, %v3243_v21  ;;  %v4094_v43 = vadd.f32 %v5980_v55, %v5976_v37  ;;  %v4125_v24 = vadd.f32 %v4124_v40, %v4123_v62 }
 0x448   : > { %v4126_v63 = vpop.f32.mrf.mxu1  ;;  %p4654_p9 = pnand %p4653_p2, %p4647_p0 }
 0x449   : > { %3352 = vst [vmem:[%s5993_s21 + $0x10] sm:$0xff] %v3344_v56  ;;  %v3330_v42 = vadd.f32 %v4533_v39, %v3308_v45  ;;  %v3194_v57 = vadd.f32 %v4094_v43, %v4054_v61  ;;  %v3248_v55 = vadd.f32 %v4125_v24, %v3183_v25 }
 0x44a   : > { %v4127_v33 = vpop.f32.mrf.mxu1 }
 0x44b   : > { %v3345_v47 = vadd.f32 %v5987_v16, %v3330_v42  ;;  %v4128_v48 = vadd.f32 %v4127_v33, %v4126_v63 }
 0x44c   : > { %v4129_v59 = vpop.f32.mrf.mxu1 }
 0x44d   : > { %3353 = vst [vmem:[%s5993_s21 + $0x18] sm:$0xff] %v3345_v47  ;;  %v3251_v6 = vadd.f32 %v4128_v48, %v3186_v4 }
 0x44e   : > { %v4130_v28 = vpop.f32.mrf.mxu1 }
 0x44f   : > { %v4131_v30 = vadd.f32 %v4130_v28, %v4129_v59 }
 0x450   : > { %v4132_v49 = vpop.f32.mrf.mxu1 }
 0x451   : > { %v3256_v12 = vadd.f32 %v4131_v30, %v3191_v29 }
 0x452   : > { %v4133_v44 = vpop.f32.mrf.mxu1 }
 0x453   : > { %v4134_v2 = vadd.f32 %v4133_v44, %v4132_v49 }
 0x454   : > { %v4217_v14 = vpop.f32.mrf.mxu1 }
 0x455   : > { %v3321_v37 = vadd.f32 %v4217_v14, %v3256_v12  ;;  %v3259_v13 = vadd.f32 %v4134_v2, %v3194_v57 }
 0x456   : > { %v3312_v0 = vpop.f32.mrf.mxu1 }
 0x457   : > { %v3333_v36 = vadd.f32 %v4534_v34, %v3321_v37  ;;  %v3313_v15 = vadd.f32 %v3312_v0, %v3248_v55 }
 0x458   : > { %v4218_v7 = vpop.f32.mrf.mxu1 }
 0x459   : > { %v3348_v38 = vadd.f32 %v5987_v16, %v3333_v36  ;;  %v3331_v51 = vadd.f32 %v4535_v5, %v3313_v15  ;;  %v3324_v32 = vadd.f32 %v4218_v7, %v3259_v13 }
 0x45a   : > { %v3315_v1 = vpop.f32.mrf.mxu1 }
 0x45b   : > { %3356 = vst [vmem:[%s5993_s21 + $0x30] sm:$0xff] %v3348_v38  ;;  %v3346_v9 = vadd.f32 %v5987_v16, %v3331_v51  ;;  %v3334_v46 = vadd.f32 %v4536_v60, %v3324_v32  ;;  %v3316_v58 = vadd.f32 %v3315_v1, %v3251_v6 }
 0x45d   : > { %3354 = vst [vmem:[%s5993_s21 + $0x20] sm:$0xff] %v3346_v9  ;;  %v3349_v26 = vadd.f32 %v5987_v16, %v3334_v46  ;;  %v3332_v52 = vadd.f32 %v4537_v8, %v3316_v58 }
 0x45f   : > { %3357 = vst [vmem:[%s5993_s21 + $0x38] sm:$0xff] %v3349_v26  ;;  %v3347_v17 = vadd.f32 %v5987_v16, %v3332_v52 }
 0x461   : > { %3355 = vst [vmem:[%s5993_s21 + $0x28] sm:$0xff] %v3347_v17 }
 0x462   : > { %4657 = shalt.err (!%p4654_p9)
}
 0x463   : > { %s4658_s20 = scalar_lea.hbm %s6035_s22, 1024  ;;  %s4662_s24 = scalar_lea.hbm %s6091_s8, 2048 }
 0x464   : > { %p4659_p1 = scmp.ne.s32.totalorder %s6035_s22, %s4658_s20  ;;  %p4663_p8 = scmp.lt.s32.totalorder %s6035_s22, %s6091_s8 }
 0x465   : > { %p4664_p3 = scmp.lt.s32.totalorder %s4662_s24, %s4658_s20 }
 0x466   : > { %p4660_p4 = pnand %p4659_p1, %p6314_p12 }
 0x467   : > { %p4665_p11 = por %p4664_p3, %p4663_p8 }
 0x468   : > { %p4661_p6 = pneg %p4660_p4 }
 0x46a   : > { %p4666_p7 = pnand %p4665_p11, %p4661_p6 }
 0x46c   : > { %4669 = shalt.err (!%p4666_p7)
}
 0x46d   : > { %s4731_s14 = smov 128   ;;  %s4732_s16 = smov 8  }
 0x46e   : > { %4249 = dma.vmem_to_hbm [thread:$0]  (%p6314_p12), %s6037_s10, 1024, %s6035_s22, %s3359_s9, %s4731_s14, %s4731_s14, %s4732_s16  }
 0x46f PF: > { %s3388_s15 = sand.u32 1, %s4704_s27   ;;  %p6315_p13 = scmp.ne.s32.totalorder %s6134_s12, 0 }
 0x470   : > { %p6316_p0 = scmp.ge.s32.totalorder %s4716_s30, 2  ;;  %s3389_s18 = scalar_lea.sflag [#allocation4], %s3388_s15 }
 0x472   : > { %p4266_p5 = pnand %p6316_p0, %p6315_p13 }
 0x474   : > { %p4267_p10 = pneg %p4266_p5 }
 0x476   : > { %4699 = dma.done.wait (%p4267_p10), %s3389_s18, 1024  }
 0x477   : > { %4701 = vsyncadd (%p4267_p10), %s3389_s18, 4294966272  ;;  %p23_p2 = scmp.ge.s32.totalorder %s4853_s19, 4   ;;  %s6317_s27 = smov %s4708_s28 }
 0x478   : > { %s6318_s28 = smov %s4712_s29  ;;  %s6319_s29 = smov %s4874_s25 }
 0x479   : > { %s6320_s30 = smov %s4853_s19  ;;  %25 = sbr.rel (!%p23_p2) target bundleno = 10 (0xa), region = 109 }
 0x47e   :  { %3394 = vsyncpa [#allocation3], 1 }
 0x47f   :  { %3396 = vsyncpa [#allocation3 + $0x1], 1 }
 0x480   :  { %3397 = vsyncpa [#allocation6], 1 }
 0x481   :  { %3398 = vsyncpa [#allocation9], 1 }
 0x482   :  { %3399 = vsyncpa [#allocation4], 1 }
 0x483   :  { %3401 = vsyncpa [#allocation4 + $0x1], 1 }

</bundles_post_ra>
